<compile_context>
chip_gen: v6e
topology: v6e:2x2x1
jax: 0.10.0
libtpu: 0.0.40
codegen_flags: <defaults>
</compile_context>

<pallas_src>
import jax
import jax.numpy as jnp
from jax.experimental import pallas as pl
from jax.experimental.pallas import tpu as pltpu


_H = _W = 16            # input canvas (all activations live on this canvas)
_HW = _H * _W           # 256 -> lane-dense flattened spatial axis
_CH = 16                # hidden channel count
_K = 3                  # conv kernel size


def _roll_lanes(v, offset):
    """shifted[..., j] = v[..., (j + offset) mod HW]  (XLU lane rotation)."""
    s = (-offset) % _HW                  # jnp.roll-style shift amount
    if s == 0:
        return v
    return pltpu.roll(v, s, axis=v.ndim - 1)


def _autoencoder_kernel(x_ref, w1_ref, b1_ref, w2_ref, b2_ref, w3_ref, b3_ref,
                        w4_ref, b4_ref, m12_ref, m14_ref, dec_ref, enc_ref):
    # x_ref      : (1, 1, 256) flattened 16x16 input image
    # w*_ref     : (16, 9) per-tap weight matrices (rows = cout or cin)
    # b*_ref     : (16, 1) or (1, 1) biases
    # m12/m14_ref: (1, 256) masks of the valid 12x12 / 14x14 top-left regions
    # dec_ref    : (1, 1, 256) decoded 16x16 image (flat)
    # enc_ref    : (1, 1, 256) encoded canvas (valid 12x12 at top-left)
    x = x_ref[0]                         # (1, 256)
    m12 = m12_ref[...]                   # (1, 256)
    m14 = m14_ref[...]                   # (1, 256)

    def conv_taps(act, w_mat, decoder):
        # act: (Cin, 256) canvas, w_mat: (16, 9).
        # encoder tap (ky,kx): read act[y+ky, x+kx]          -> offset +(16*ky+kx)
        # decoder tap (a ,b ): read act[y+a-2, x+b-2] (0 pad) -> offset  (16*(a-2)+(b-2))
        # (out-of-range reads wrap onto masked-zero rows/cols of the canvas)
        acc = jnp.zeros((_CH, _HW), jnp.float32)
        for ky in range(_K):
            for kx in range(_K):
                t = ky * _K + kx
                if decoder:
                    off = _W * (ky - (_K - 1)) + (kx - (_K - 1))
                else:
                    off = _W * ky + kx
                acc = acc + w_mat[:, t:t + 1] * _roll_lanes(act, off)
        return acc

    # ---- encoder layer 1: Conv2d(1,16,3) + ReLU   (valid 14x14) ----------
    e1 = jnp.maximum(conv_taps(x, w1_ref[...], False) + b1_ref[...], 0.0)

    # ---- encoder layer 2: Conv2d(16,1,3) + ReLU   (valid 12x12) ----------
    acc = conv_taps(e1, w2_ref[...], False)                  # per-cin partials
    e2 = jnp.maximum(jnp.sum(acc, axis=0, keepdims=True) + b2_ref[...], 0.0)
    e2 = e2 * m12                        # zero outside valid region (= zero pad)
    enc_ref[0] = e2

    # ---- decoder layer 1: ConvTranspose2d(1,16,3) + ReLU  (valid 14x14) --
    d1 = jnp.maximum(conv_taps(e2, w3_ref[...], True) + b3_ref[...], 0.0)
    d1 = d1 * m14                        # zero outside valid region (= zero pad)

    # ---- decoder layer 2: ConvTranspose2d(16,1,3) + Tanh  (full 16x16) ---
    acc = conv_taps(d1, w4_ref[...], True)
    dec_ref[0] = jnp.tanh(jnp.sum(acc, axis=0, keepdims=True) + b4_ref[...])


@jax.jit
def autoencoder_forward(x_nchw, params):
    (w1, b1), (w2, b2), (w3, b3), (w4, b4) = params
    N = x_nchw.shape[0]

    x_flat = x_nchw.astype(jnp.float32).reshape(N, 1, _HW)

    # Per-tap weight matrices (16, 9) -- decoder kernels spatially flipped
    # (ConvTranspose == pad-by-2 + valid conv with flipped kernel).
    w1m = w1.reshape(_CH, _K * _K)                            # [cout, ky*3+kx]
    w2m = w2[0].reshape(_CH, _K * _K)                         # [cin , ky*3+kx]
    w3m = jnp.flip(w3, (2, 3))[0].reshape(_CH, _K * _K)       # [cout, a*3+b]
    w4m = jnp.flip(w4, (2, 3))[:, 0].reshape(_CH, _K * _K)    # [cin , a*3+b]
    b1c, b3c = b1.reshape(_CH, 1), b3.reshape(_CH, 1)
    b2c, b4c = b2.reshape(1, 1), b4.reshape(1, 1)

    # Valid-region masks (constants under jit).
    idx = jnp.arange(_HW)
    yy, xx = idx // _W, idx % _W
    m12 = ((yy < 12) & (xx < 12)).astype(jnp.float32).reshape(1, _HW)
    m14 = ((yy < 14) & (xx < 14)).astype(jnp.float32).reshape(1, _HW)

    img_spec = pl.BlockSpec((1, 1, _HW), lambda n: (n, 0, 0))

    def full2d(shape):
        return pl.BlockSpec(shape, lambda n: (0, 0))

    flops = N * 4 * _K * _K * 2 * _CH * _HW
    cost = pl.CostEstimate(
        flops=flops,
        transcendentals=N * _HW,
        bytes_accessed=4 * (3 * N * _HW + 4 * _CH * _K * _K + 2 * _CH + 2
                            + 2 * _HW))

    dec_flat, enc_flat = pl.pallas_call(
        _autoencoder_kernel,
        out_shape=(jax.ShapeDtypeStruct((N, 1, _HW), jnp.float32),
                   jax.ShapeDtypeStruct((N, 1, _HW), jnp.float32)),
        grid=(N,),
        in_specs=[
            img_spec,
            full2d((_CH, _K * _K)), full2d((_CH, 1)),
            full2d((_CH, _K * _K)), full2d((1, 1)),
            full2d((_CH, _K * _K)), full2d((_CH, 1)),
            full2d((_CH, _K * _K)), full2d((1, 1)),
            full2d((1, _HW)), full2d((1, _HW)),
        ],
        out_specs=(img_spec, img_spec),
        compiler_params=pltpu.CompilerParams(
            dimension_semantics=("parallel",)),
        cost_estimate=cost,
    )(x_flat, w1m, b1c, w2m, b2c, w3m, b3c, w4m, b4c, m12, m14)

    decoded = dec_flat.reshape(N, 1, _H, _W)
    encoded = enc_flat.reshape(N, _H, _W)[:, :12, :12].reshape(N, 1, 12, 12)
    return decoded, encoded


# ----------------------------------------------------------------------------
# Pure-JAX reference (lax.conv) used only for a numerical self-check.
# ----------------------------------------------------------------------------
def _reference_forward(x, params):
    (w1, b1), (w2, b2), (w3, b3), (w4, b4) = params
    dn = ("NCHW", "OIHW", "NCHW")

    def conv(t, w):
        return jax.lax.conv_general_dilated(t, w, (1, 1), "VALID",
                                            dimension_numbers=dn)

    def convT(t, w, b):   # ConvTranspose2d (stride 1, pad 0)
        wf = jnp.transpose(jnp.flip(w, (2, 3)), (1, 0, 2, 3))
        tp = jnp.pad(t, ((0, 0), (0, 0), (2, 2), (2, 2)))
        return conv(tp, wf) + b[None, :, None, None]

    e1 = jax.nn.relu(conv(x, w1) + b1[None, :, None, None])
    e2 = jax.nn.relu(conv(e1, w2) + b2[None, :, None, None])
    d1 = jax.nn.relu(convT(e2, w3, b3))
    d2 = jnp.tanh(convT(d1, w4, b4))
    return d2, e2


# ----------------------------------------------------------------------------
# Deterministic PyTorch-style parameter init
# ----------------------------------------------------------------------------
def _init_conv(key, cout, cin, k):
    kw_key, kb_key = jax.random.split(key)
    bound = 1.0 / (cin * k * k) ** 0.5
    w = jax.random.uniform(kw_key, (cout, cin, k, k), jnp.float32, -bound, bound)
    b = jax.random.uniform(kb_key, (cout,), jnp.float32, -bound, bound)
    return w, b


def _init_convT(key, cin, cout, k):
    kw_key, kb_key = jax.random.split(key)
    bound = 1.0 / (cin * k * k) ** 0.5
    w = jax.random.uniform(kw_key, (cin, cout, k, k), jnp.float32, -bound, bound)
    b = jax.random.uniform(kb_key, (cout,), jnp.float32, -bound, bound)
    return w, b


if __name__ == "__main__":
    root = jax.random.PRNGKey(0)
    k_x, k1, k2, k3, k4 = jax.random.split(root, 5)

    # small deterministic input consistent with the module: (N=2, C=1, H=W=16)
    x = jax.random.normal(k_x, (2, 1, 16, 16), jnp.float32)

    params = (
        _init_conv(k1, 16, 1, 3),    # Conv2d(1, 16, 3)
        _init_conv(k2, 1, 16, 3),    # Conv2d(16, 1, 3)
        _init_convT(k3, 1, 16, 3),   # ConvTranspose2d(1, 16, 3)
        _init_convT(k4, 16, 1, 3),   # ConvTranspose2d(16, 1, 3)
    )

    decoded, encoded = autoencoder_forward(x, params)
    jax.block_until_ready((decoded, encoded))

    assert decoded.shape == (2, 1, 16, 16), decoded.shape
    assert encoded.shape == (2, 1, 12, 12), encoded.shape

    # numerical self-check against a pure-JAX (lax.conv) reference
    dec_expected, enc_expected = jax.jit(_reference_forward)(x, params)
    jax.block_until_ready((dec_expected, enc_expected))
    assert jnp.allclose(decoded, dec_expected, atol=1e-4, rtol=1e-4), \
        float(jnp.max(jnp.abs(decoded - dec_expected)))
    assert jnp.allclose(encoded, enc_expected, atol=1e-4, rtol=1e-4), \
        float(jnp.max(jnp.abs(encoded - enc_expected)))

    print("KERNEL_OK")
</pallas_src>

<mosaic_0001>
module attributes {stable_mosaic.version = 11 : i64} {
  func.func @_autoencoder_kernel(%arg0: i32, %arg1: memref<1x1x256xf32, #tpu.memory_space<vmem>>, %arg2: memref<16x9xf32, #tpu.memory_space<vmem>>, %arg3: memref<16x1xf32, #tpu.memory_space<vmem>>, %arg4: memref<16x9xf32, #tpu.memory_space<vmem>>, %arg5: memref<1x1xf32, #tpu.memory_space<vmem>>, %arg6: memref<16x9xf32, #tpu.memory_space<vmem>>, %arg7: memref<16x1xf32, #tpu.memory_space<vmem>>, %arg8: memref<16x9xf32, #tpu.memory_space<vmem>>, %arg9: memref<1x1xf32, #tpu.memory_space<vmem>>, %arg10: memref<1x256xf32, #tpu.memory_space<vmem>>, %arg11: memref<1x256xf32, #tpu.memory_space<vmem>>, %arg12: memref<1x1x256xf32, #tpu.memory_space<vmem>>, %arg13: memref<1x1x256xf32, #tpu.memory_space<vmem>>) attributes {dimension_semantics = [#tpu.dimension_semantics<parallel>], iteration_bounds = array<i64: 2>, scalar_prefetch = 0 : i64, scratch_operands = 0 : i64, tpu.core_type = #tpu.core_type<tc>, window_params = [{transform_indices = @transform_0, window_bounds = array<i64: 1, 1, 256>}, {pipeline_mode = #tpu.pipeline_mode<synchronous>, transform_indices = @transform_1, window_bounds = array<i64: 16, 9>}, {pipeline_mode = #tpu.pipeline_mode<synchronous>, transform_indices = @transform_2, window_bounds = array<i64: 16, 1>}, {pipeline_mode = #tpu.pipeline_mode<synchronous>, transform_indices = @transform_3, window_bounds = array<i64: 16, 9>}, {pipeline_mode = #tpu.pipeline_mode<synchronous>, transform_indices = @transform_4, window_bounds = array<i64: 1, 1>}, {pipeline_mode = #tpu.pipeline_mode<synchronous>, transform_indices = @transform_5, window_bounds = array<i64: 16, 9>}, {pipeline_mode = #tpu.pipeline_mode<synchronous>, transform_indices = @transform_6, window_bounds = array<i64: 16, 1>}, {pipeline_mode = #tpu.pipeline_mode<synchronous>, transform_indices = @transform_7, window_bounds = array<i64: 16, 9>}, {pipeline_mode = #tpu.pipeline_mode<synchronous>, transform_indices = @transform_8, window_bounds = array<i64: 1, 1>}, {pipeline_mode = #tpu.pipeline_mode<synchronous>, transform_indices = @transform_9, window_bounds = array<i64: 1, 256>}, {pipeline_mode = #tpu.pipeline_mode<synchronous>, transform_indices = @transform_10, window_bounds = array<i64: 1, 256>}, {transform_indices = @transform_11, window_bounds = array<i64: 1, 1, 256>}, {transform_indices = @transform_12, window_bounds = array<i64: 1, 1, 256>}]} {
    %c0 = arith.constant 0 : index
    %c0_0 = arith.constant 0 : index
    %c0_1 = arith.constant 0 : index
    %0 = vector.load %arg1[%c0, %c0_0, %c0_1] : memref<1x1x256xf32, #tpu.memory_space<vmem>>, vector<1x1x256xf32>
    %1 = vector.shape_cast %0 : vector<1x1x256xf32> to vector<1x256xf32>
    %c0_2 = arith.constant 0 : index
    %c0_3 = arith.constant 0 : index
    %2 = vector.load %arg10[%c0_2, %c0_3] : memref<1x256xf32, #tpu.memory_space<vmem>>, vector<1x256xf32>
    %c0_4 = arith.constant 0 : index
    %c0_5 = arith.constant 0 : index
    %3 = vector.load %arg11[%c0_4, %c0_5] : memref<1x256xf32, #tpu.memory_space<vmem>>, vector<1x256xf32>
    %c0_6 = arith.constant 0 : index
    %c0_7 = arith.constant 0 : index
    %4 = vector.load %arg2[%c0_6, %c0_7] : memref<16x9xf32, #tpu.memory_space<vmem>>, vector<16x9xf32>
    %cst = arith.constant 0.000000e+00 : f32
    %5 = vector.broadcast %cst : f32 to vector<16x256xf32>
    %6 = vector.extract_strided_slice %4 {offsets = [0, 0], sizes = [16, 1], strides = [1, 1]} : vector<16x9xf32> to vector<16x1xf32>
    %7 = vector.broadcast %6 : vector<16x1xf32> to vector<16x256xf32>
    %8 = vector.broadcast %1 : vector<1x256xf32> to vector<16x256xf32>
    %9 = arith.mulf %7, %8 : vector<16x256xf32>
    %10 = arith.addf %5, %9 : vector<16x256xf32>
    %11 = vector.extract_strided_slice %4 {offsets = [0, 1], sizes = [16, 1], strides = [1, 1]} : vector<16x9xf32> to vector<16x1xf32>
    %c255_i32 = arith.constant 255 : i32
    %12 = tpu.dynamic_rotate %1 by %c255_i32 dim 1 : vector<1x256xf32>, i32 -> vector<1x256xf32>
    %13 = vector.broadcast %11 : vector<16x1xf32> to vector<16x256xf32>
    %14 = vector.broadcast %12 : vector<1x256xf32> to vector<16x256xf32>
    %15 = arith.mulf %13, %14 : vector<16x256xf32>
    %16 = arith.addf %10, %15 : vector<16x256xf32>
    %17 = vector.extract_strided_slice %4 {offsets = [0, 2], sizes = [16, 1], strides = [1, 1]} : vector<16x9xf32> to vector<16x1xf32>
    %c254_i32 = arith.constant 254 : i32
    %18 = tpu.dynamic_rotate %1 by %c254_i32 dim 1 : vector<1x256xf32>, i32 -> vector<1x256xf32>
    %19 = vector.broadcast %17 : vector<16x1xf32> to vector<16x256xf32>
    %20 = vector.broadcast %18 : vector<1x256xf32> to vector<16x256xf32>
    %21 = arith.mulf %19, %20 : vector<16x256xf32>
    %22 = arith.addf %16, %21 : vector<16x256xf32>
    %23 = vector.extract_strided_slice %4 {offsets = [0, 3], sizes = [16, 1], strides = [1, 1]} : vector<16x9xf32> to vector<16x1xf32>
    %c240_i32 = arith.constant 240 : i32
    %24 = tpu.dynamic_rotate %1 by %c240_i32 dim 1 : vector<1x256xf32>, i32 -> vector<1x256xf32>
    %25 = vector.broadcast %23 : vector<16x1xf32> to vector<16x256xf32>
    %26 = vector.broadcast %24 : vector<1x256xf32> to vector<16x256xf32>
    %27 = arith.mulf %25, %26 : vector<16x256xf32>
    %28 = arith.addf %22, %27 : vector<16x256xf32>
    %29 = vector.extract_strided_slice %4 {offsets = [0, 4], sizes = [16, 1], strides = [1, 1]} : vector<16x9xf32> to vector<16x1xf32>
    %c239_i32 = arith.constant 239 : i32
    %30 = tpu.dynamic_rotate %1 by %c239_i32 dim 1 : vector<1x256xf32>, i32 -> vector<1x256xf32>
    %31 = vector.broadcast %29 : vector<16x1xf32> to vector<16x256xf32>
    %32 = vector.broadcast %30 : vector<1x256xf32> to vector<16x256xf32>
    %33 = arith.mulf %31, %32 : vector<16x256xf32>
    %34 = arith.addf %28, %33 : vector<16x256xf32>
    %35 = vector.extract_strided_slice %4 {offsets = [0, 5], sizes = [16, 1], strides = [1, 1]} : vector<16x9xf32> to vector<16x1xf32>
    %c238_i32 = arith.constant 238 : i32
    %36 = tpu.dynamic_rotate %1 by %c238_i32 dim 1 : vector<1x256xf32>, i32 -> vector<1x256xf32>
    %37 = vector.broadcast %35 : vector<16x1xf32> to vector<16x256xf32>
    %38 = vector.broadcast %36 : vector<1x256xf32> to vector<16x256xf32>
    %39 = arith.mulf %37, %38 : vector<16x256xf32>
    %40 = arith.addf %34, %39 : vector<16x256xf32>
    %41 = vector.extract_strided_slice %4 {offsets = [0, 6], sizes = [16, 1], strides = [1, 1]} : vector<16x9xf32> to vector<16x1xf32>
    %c224_i32 = arith.constant 224 : i32
    %42 = tpu.dynamic_rotate %1 by %c224_i32 dim 1 : vector<1x256xf32>, i32 -> vector<1x256xf32>
    %43 = vector.broadcast %41 : vector<16x1xf32> to vector<16x256xf32>
    %44 = vector.broadcast %42 : vector<1x256xf32> to vector<16x256xf32>
    %45 = arith.mulf %43, %44 : vector<16x256xf32>
    %46 = arith.addf %40, %45 : vector<16x256xf32>
    %47 = vector.extract_strided_slice %4 {offsets = [0, 7], sizes = [16, 1], strides = [1, 1]} : vector<16x9xf32> to vector<16x1xf32>
    %c223_i32 = arith.constant 223 : i32
    %48 = tpu.dynamic_rotate %1 by %c223_i32 dim 1 : vector<1x256xf32>, i32 -> vector<1x256xf32>
    %49 = vector.broadcast %47 : vector<16x1xf32> to vector<16x256xf32>
    %50 = vector.broadcast %48 : vector<1x256xf32> to vector<16x256xf32>
    %51 = arith.mulf %49, %50 : vector<16x256xf32>
    %52 = arith.addf %46, %51 : vector<16x256xf32>
    %53 = vector.extract_strided_slice %4 {offsets = [0, 8], sizes = [16, 1], strides = [1, 1]} : vector<16x9xf32> to vector<16x1xf32>
    %c222_i32 = arith.constant 222 : i32
    %54 = tpu.dynamic_rotate %1 by %c222_i32 dim 1 : vector<1x256xf32>, i32 -> vector<1x256xf32>
    %55 = vector.broadcast %53 : vector<16x1xf32> to vector<16x256xf32>
    %56 = vector.broadcast %54 : vector<1x256xf32> to vector<16x256xf32>
    %57 = arith.mulf %55, %56 : vector<16x256xf32>
    %58 = arith.addf %52, %57 : vector<16x256xf32>
    %c0_8 = arith.constant 0 : index
    %c0_9 = arith.constant 0 : index
    %59 = vector.load %arg3[%c0_8, %c0_9] : memref<16x1xf32, #tpu.memory_space<vmem>>, vector<16x1xf32>
    %60 = vector.broadcast %59 : vector<16x1xf32> to vector<16x256xf32>
    %61 = arith.addf %58, %60 : vector<16x256xf32>
    %cst_10 = arith.constant 0.000000e+00 : f32
    %62 = vector.broadcast %cst_10 : f32 to vector<16x256xf32>
    %63 = arith.maximumf %61, %62 : vector<16x256xf32>
    %c0_11 = arith.constant 0 : index
    %c0_12 = arith.constant 0 : index
    %64 = vector.load %arg4[%c0_11, %c0_12] : memref<16x9xf32, #tpu.memory_space<vmem>>, vector<16x9xf32>
    %cst_13 = arith.constant 0.000000e+00 : f32
    %65 = vector.broadcast %cst_13 : f32 to vector<16x256xf32>
    %66 = vector.extract_strided_slice %64 {offsets = [0, 0], sizes = [16, 1], strides = [1, 1]} : vector<16x9xf32> to vector<16x1xf32>
    %67 = vector.broadcast %66 : vector<16x1xf32> to vector<16x256xf32>
    %68 = arith.mulf %67, %63 : vector<16x256xf32>
    %69 = arith.addf %65, %68 : vector<16x256xf32>
    %70 = vector.extract_strided_slice %64 {offsets = [0, 1], sizes = [16, 1], strides = [1, 1]} : vector<16x9xf32> to vector<16x1xf32>
    %c255_i32_14 = arith.constant 255 : i32
    %71 = tpu.dynamic_rotate %63 by %c255_i32_14 dim 1 : vector<16x256xf32>, i32 -> vector<16x256xf32>
    %72 = vector.broadcast %70 : vector<16x1xf32> to vector<16x256xf32>
    %73 = arith.mulf %72, %71 : vector<16x256xf32>
    %74 = arith.addf %69, %73 : vector<16x256xf32>
    %75 = vector.extract_strided_slice %64 {offsets = [0, 2], sizes = [16, 1], strides = [1, 1]} : vector<16x9xf32> to vector<16x1xf32>
    %c254_i32_15 = arith.constant 254 : i32
    %76 = tpu.dynamic_rotate %63 by %c254_i32_15 dim 1 : vector<16x256xf32>, i32 -> vector<16x256xf32>
    %77 = vector.broadcast %75 : vector<16x1xf32> to vector<16x256xf32>
    %78 = arith.mulf %77, %76 : vector<16x256xf32>
    %79 = arith.addf %74, %78 : vector<16x256xf32>
    %80 = vector.extract_strided_slice %64 {offsets = [0, 3], sizes = [16, 1], strides = [1, 1]} : vector<16x9xf32> to vector<16x1xf32>
    %c240_i32_16 = arith.constant 240 : i32
    %81 = tpu.dynamic_rotate %63 by %c240_i32_16 dim 1 : vector<16x256xf32>, i32 -> vector<16x256xf32>
    %82 = vector.broadcast %80 : vector<16x1xf32> to vector<16x256xf32>
    %83 = arith.mulf %82, %81 : vector<16x256xf32>
    %84 = arith.addf %79, %83 : vector<16x256xf32>
    %85 = vector.extract_strided_slice %64 {offsets = [0, 4], sizes = [16, 1], strides = [1, 1]} : vector<16x9xf32> to vector<16x1xf32>
    %c239_i32_17 = arith.constant 239 : i32
    %86 = tpu.dynamic_rotate %63 by %c239_i32_17 dim 1 : vector<16x256xf32>, i32 -> vector<16x256xf32>
    %87 = vector.broadcast %85 : vector<16x1xf32> to vector<16x256xf32>
    %88 = arith.mulf %87, %86 : vector<16x256xf32>
    %89 = arith.addf %84, %88 : vector<16x256xf32>
    %90 = vector.extract_strided_slice %64 {offsets = [0, 5], sizes = [16, 1], strides = [1, 1]} : vector<16x9xf32> to vector<16x1xf32>
    %c238_i32_18 = arith.constant 238 : i32
    %91 = tpu.dynamic_rotate %63 by %c238_i32_18 dim 1 : vector<16x256xf32>, i32 -> vector<16x256xf32>
    %92 = vector.broadcast %90 : vector<16x1xf32> to vector<16x256xf32>
    %93 = arith.mulf %92, %91 : vector<16x256xf32>
    %94 = arith.addf %89, %93 : vector<16x256xf32>
    %95 = vector.extract_strided_slice %64 {offsets = [0, 6], sizes = [16, 1], strides = [1, 1]} : vector<16x9xf32> to vector<16x1xf32>
    %c224_i32_19 = arith.constant 224 : i32
    %96 = tpu.dynamic_rotate %63 by %c224_i32_19 dim 1 : vector<16x256xf32>, i32 -> vector<16x256xf32>
    %97 = vector.broadcast %95 : vector<16x1xf32> to vector<16x256xf32>
    %98 = arith.mulf %97, %96 : vector<16x256xf32>
    %99 = arith.addf %94, %98 : vector<16x256xf32>
    %100 = vector.extract_strided_slice %64 {offsets = [0, 7], sizes = [16, 1], strides = [1, 1]} : vector<16x9xf32> to vector<16x1xf32>
    %c223_i32_20 = arith.constant 223 : i32
    %101 = tpu.dynamic_rotate %63 by %c223_i32_20 dim 1 : vector<16x256xf32>, i32 -> vector<16x256xf32>
    %102 = vector.broadcast %100 : vector<16x1xf32> to vector<16x256xf32>
    %103 = arith.mulf %102, %101 : vector<16x256xf32>
    %104 = arith.addf %99, %103 : vector<16x256xf32>
    %105 = vector.extract_strided_slice %64 {offsets = [0, 8], sizes = [16, 1], strides = [1, 1]} : vector<16x9xf32> to vector<16x1xf32>
    %c222_i32_21 = arith.constant 222 : i32
    %106 = tpu.dynamic_rotate %63 by %c222_i32_21 dim 1 : vector<16x256xf32>, i32 -> vector<16x256xf32>
    %107 = vector.broadcast %105 : vector<16x1xf32> to vector<16x256xf32>
    %108 = arith.mulf %107, %106 : vector<16x256xf32>
    %109 = arith.addf %104, %108 : vector<16x256xf32>
    %cst_22 = arith.constant dense<0.000000e+00> : vector<256xf32>
    %110 = vector.multi_reduction <add>, %109, %cst_22 [0] : vector<16x256xf32> to vector<256xf32>
    %111 = vector.shape_cast %110 : vector<256xf32> to vector<1x256xf32>
    %c0_23 = arith.constant 0 : index
    %c0_24 = arith.constant 0 : index
    %112 = vector.load %arg5[%c0_23, %c0_24] : memref<1x1xf32, #tpu.memory_space<vmem>>, vector<1x1xf32>
    %113 = vector.broadcast %112 : vector<1x1xf32> to vector<1x256xf32>
    %114 = arith.addf %111, %113 : vector<1x256xf32>
    %cst_25 = arith.constant 0.000000e+00 : f32
    %115 = vector.broadcast %cst_25 : f32 to vector<1x256xf32>
    %116 = arith.maximumf %114, %115 : vector<1x256xf32>
    %117 = arith.mulf %116, %2 : vector<1x256xf32>
    %c0_26 = arith.constant 0 : index
    %c0_27 = arith.constant 0 : index
    %c0_28 = arith.constant 0 : index
    %118 = vector.load %arg13[%c0_26, %c0_27, %c0_28] : memref<1x1x256xf32, #tpu.memory_space<vmem>>, vector<1x1x256xf32>
    %119 = vector.shape_cast %118 : vector<1x1x256xf32> to vector<1x256xf32>
    %120 = vector.shape_cast %117 : vector<1x256xf32> to vector<1x1x256xf32>
    tpu.vector_store %arg13[%c0_26, %c0_27, %c0_28], %120 {strides = array<i32>} : memref<1x1x256xf32, #tpu.memory_space<vmem>>, vector<1x1x256xf32>,
    %c0_29 = arith.constant 0 : index
    %c0_30 = arith.constant 0 : index
    %121 = vector.load %arg6[%c0_29, %c0_30] : memref<16x9xf32, #tpu.memory_space<vmem>>, vector<16x9xf32>
    %cst_31 = arith.constant 0.000000e+00 : f32
    %122 = vector.broadcast %cst_31 : f32 to vector<16x256xf32>
    %123 = vector.extract_strided_slice %121 {offsets = [0, 0], sizes = [16, 1], strides = [1, 1]} : vector<16x9xf32> to vector<16x1xf32>
    %c34_i32 = arith.constant 34 : i32
    %124 = tpu.dynamic_rotate %117 by %c34_i32 dim 1 : vector<1x256xf32>, i32 -> vector<1x256xf32>
    %125 = vector.broadcast %123 : vector<16x1xf32> to vector<16x256xf32>
    %126 = vector.broadcast %124 : vector<1x256xf32> to vector<16x256xf32>
    %127 = arith.mulf %125, %126 : vector<16x256xf32>
    %128 = arith.addf %122, %127 : vector<16x256xf32>
    %129 = vector.extract_strided_slice %121 {offsets = [0, 1], sizes = [16, 1], strides = [1, 1]} : vector<16x9xf32> to vector<16x1xf32>
    %c33_i32 = arith.constant 33 : i32
    %130 = tpu.dynamic_rotate %117 by %c33_i32 dim 1 : vector<1x256xf32>, i32 -> vector<1x256xf32>
    %131 = vector.broadcast %129 : vector<16x1xf32> to vector<16x256xf32>
    %132 = vector.broadcast %130 : vector<1x256xf32> to vector<16x256xf32>
    %133 = arith.mulf %131, %132 : vector<16x256xf32>
    %134 = arith.addf %128, %133 : vector<16x256xf32>
    %135 = vector.extract_strided_slice %121 {offsets = [0, 2], sizes = [16, 1], strides = [1, 1]} : vector<16x9xf32> to vector<16x1xf32>
    %c32_i32 = arith.constant 32 : i32
    %136 = tpu.dynamic_rotate %117 by %c32_i32 dim 1 : vector<1x256xf32>, i32 -> vector<1x256xf32>
    %137 = vector.broadcast %135 : vector<16x1xf32> to vector<16x256xf32>
    %138 = vector.broadcast %136 : vector<1x256xf32> to vector<16x256xf32>
    %139 = arith.mulf %137, %138 : vector<16x256xf32>
    %140 = arith.addf %134, %139 : vector<16x256xf32>
    %141 = vector.extract_strided_slice %121 {offsets = [0, 3], sizes = [16, 1], strides = [1, 1]} : vector<16x9xf32> to vector<16x1xf32>
    %c18_i32 = arith.constant 18 : i32
    %142 = tpu.dynamic_rotate %117 by %c18_i32 dim 1 : vector<1x256xf32>, i32 -> vector<1x256xf32>
    %143 = vector.broadcast %141 : vector<16x1xf32> to vector<16x256xf32>
    %144 = vector.broadcast %142 : vector<1x256xf32> to vector<16x256xf32>
    %145 = arith.mulf %143, %144 : vector<16x256xf32>
    %146 = arith.addf %140, %145 : vector<16x256xf32>
    %147 = vector.extract_strided_slice %121 {offsets = [0, 4], sizes = [16, 1], strides = [1, 1]} : vector<16x9xf32> to vector<16x1xf32>
    %c17_i32 = arith.constant 17 : i32
    %148 = tpu.dynamic_rotate %117 by %c17_i32 dim 1 : vector<1x256xf32>, i32 -> vector<1x256xf32>
    %149 = vector.broadcast %147 : vector<16x1xf32> to vector<16x256xf32>
    %150 = vector.broadcast %148 : vector<1x256xf32> to vector<16x256xf32>
    %151 = arith.mulf %149, %150 : vector<16x256xf32>
    %152 = arith.addf %146, %151 : vector<16x256xf32>
    %153 = vector.extract_strided_slice %121 {offsets = [0, 5], sizes = [16, 1], strides = [1, 1]} : vector<16x9xf32> to vector<16x1xf32>
    %c16_i32 = arith.constant 16 : i32
    %154 = tpu.dynamic_rotate %117 by %c16_i32 dim 1 : vector<1x256xf32>, i32 -> vector<1x256xf32>
    %155 = vector.broadcast %153 : vector<16x1xf32> to vector<16x256xf32>
    %156 = vector.broadcast %154 : vector<1x256xf32> to vector<16x256xf32>
    %157 = arith.mulf %155, %156 : vector<16x256xf32>
    %158 = arith.addf %152, %157 : vector<16x256xf32>
    %159 = vector.extract_strided_slice %121 {offsets = [0, 6], sizes = [16, 1], strides = [1, 1]} : vector<16x9xf32> to vector<16x1xf32>
    %c2_i32 = arith.constant 2 : i32
    %160 = tpu.dynamic_rotate %117 by %c2_i32 dim 1 : vector<1x256xf32>, i32 -> vector<1x256xf32>
    %161 = vector.broadcast %159 : vector<16x1xf32> to vector<16x256xf32>
    %162 = vector.broadcast %160 : vector<1x256xf32> to vector<16x256xf32>
    %163 = arith.mulf %161, %162 : vector<16x256xf32>
    %164 = arith.addf %158, %163 : vector<16x256xf32>
    %165 = vector.extract_strided_slice %121 {offsets = [0, 7], sizes = [16, 1], strides = [1, 1]} : vector<16x9xf32> to vector<16x1xf32>
    %c1_i32 = arith.constant 1 : i32
    %166 = tpu.dynamic_rotate %117 by %c1_i32 dim 1 : vector<1x256xf32>, i32 -> vector<1x256xf32>
    %167 = vector.broadcast %165 : vector<16x1xf32> to vector<16x256xf32>
    %168 = vector.broadcast %166 : vector<1x256xf32> to vector<16x256xf32>
    %169 = arith.mulf %167, %168 : vector<16x256xf32>
    %170 = arith.addf %164, %169 : vector<16x256xf32>
    %171 = vector.extract_strided_slice %121 {offsets = [0, 8], sizes = [16, 1], strides = [1, 1]} : vector<16x9xf32> to vector<16x1xf32>
    %172 = vector.broadcast %171 : vector<16x1xf32> to vector<16x256xf32>
    %173 = vector.broadcast %117 : vector<1x256xf32> to vector<16x256xf32>
    %174 = arith.mulf %172, %173 : vector<16x256xf32>
    %175 = arith.addf %170, %174 : vector<16x256xf32>
    %c0_32 = arith.constant 0 : index
    %c0_33 = arith.constant 0 : index
    %176 = vector.load %arg7[%c0_32, %c0_33] : memref<16x1xf32, #tpu.memory_space<vmem>>, vector<16x1xf32>
    %177 = vector.broadcast %176 : vector<16x1xf32> to vector<16x256xf32>
    %178 = arith.addf %175, %177 : vector<16x256xf32>
    %cst_34 = arith.constant 0.000000e+00 : f32
    %179 = vector.broadcast %cst_34 : f32 to vector<16x256xf32>
    %180 = arith.maximumf %178, %179 : vector<16x256xf32>
    %181 = vector.broadcast %3 : vector<1x256xf32> to vector<16x256xf32>
    %182 = arith.mulf %180, %181 : vector<16x256xf32>
    %c0_35 = arith.constant 0 : index
    %c0_36 = arith.constant 0 : index
    %183 = vector.load %arg8[%c0_35, %c0_36] : memref<16x9xf32, #tpu.memory_space<vmem>>, vector<16x9xf32>
    %cst_37 = arith.constant 0.000000e+00 : f32
    %184 = vector.broadcast %cst_37 : f32 to vector<16x256xf32>
    %185 = vector.extract_strided_slice %183 {offsets = [0, 0], sizes = [16, 1], strides = [1, 1]} : vector<16x9xf32> to vector<16x1xf32>
    %c34_i32_38 = arith.constant 34 : i32
    %186 = tpu.dynamic_rotate %182 by %c34_i32_38 dim 1 : vector<16x256xf32>, i32 -> vector<16x256xf32>
    %187 = vector.broadcast %185 : vector<16x1xf32> to vector<16x256xf32>
    %188 = arith.mulf %187, %186 : vector<16x256xf32>
    %189 = arith.addf %184, %188 : vector<16x256xf32>
    %190 = vector.extract_strided_slice %183 {offsets = [0, 1], sizes = [16, 1], strides = [1, 1]} : vector<16x9xf32> to vector<16x1xf32>
    %c33_i32_39 = arith.constant 33 : i32
    %191 = tpu.dynamic_rotate %182 by %c33_i32_39 dim 1 : vector<16x256xf32>, i32 -> vector<16x256xf32>
    %192 = vector.broadcast %190 : vector<16x1xf32> to vector<16x256xf32>
    %193 = arith.mulf %192, %191 : vector<16x256xf32>
    %194 = arith.addf %189, %193 : vector<16x256xf32>
    %195 = vector.extract_strided_slice %183 {offsets = [0, 2], sizes = [16, 1], strides = [1, 1]} : vector<16x9xf32> to vector<16x1xf32>
    %c32_i32_40 = arith.constant 32 : i32
    %196 = tpu.dynamic_rotate %182 by %c32_i32_40 dim 1 : vector<16x256xf32>, i32 -> vector<16x256xf32>
    %197 = vector.broadcast %195 : vector<16x1xf32> to vector<16x256xf32>
    %198 = arith.mulf %197, %196 : vector<16x256xf32>
    %199 = arith.addf %194, %198 : vector<16x256xf32>
    %200 = vector.extract_strided_slice %183 {offsets = [0, 3], sizes = [16, 1], strides = [1, 1]} : vector<16x9xf32> to vector<16x1xf32>
    %c18_i32_41 = arith.constant 18 : i32
    %201 = tpu.dynamic_rotate %182 by %c18_i32_41 dim 1 : vector<16x256xf32>, i32 -> vector<16x256xf32>
    %202 = vector.broadcast %200 : vector<16x1xf32> to vector<16x256xf32>
    %203 = arith.mulf %202, %201 : vector<16x256xf32>
    %204 = arith.addf %199, %203 : vector<16x256xf32>
    %205 = vector.extract_strided_slice %183 {offsets = [0, 4], sizes = [16, 1], strides = [1, 1]} : vector<16x9xf32> to vector<16x1xf32>
    %c17_i32_42 = arith.constant 17 : i32
    %206 = tpu.dynamic_rotate %182 by %c17_i32_42 dim 1 : vector<16x256xf32>, i32 -> vector<16x256xf32>
    %207 = vector.broadcast %205 : vector<16x1xf32> to vector<16x256xf32>
    %208 = arith.mulf %207, %206 : vector<16x256xf32>
    %209 = arith.addf %204, %208 : vector<16x256xf32>
    %210 = vector.extract_strided_slice %183 {offsets = [0, 5], sizes = [16, 1], strides = [1, 1]} : vector<16x9xf32> to vector<16x1xf32>
    %c16_i32_43 = arith.constant 16 : i32
    %211 = tpu.dynamic_rotate %182 by %c16_i32_43 dim 1 : vector<16x256xf32>, i32 -> vector<16x256xf32>
    %212 = vector.broadcast %210 : vector<16x1xf32> to vector<16x256xf32>
    %213 = arith.mulf %212, %211 : vector<16x256xf32>
    %214 = arith.addf %209, %213 : vector<16x256xf32>
    %215 = vector.extract_strided_slice %183 {offsets = [0, 6], sizes = [16, 1], strides = [1, 1]} : vector<16x9xf32> to vector<16x1xf32>
    %c2_i32_44 = arith.constant 2 : i32
    %216 = tpu.dynamic_rotate %182 by %c2_i32_44 dim 1 : vector<16x256xf32>, i32 -> vector<16x256xf32>
    %217 = vector.broadcast %215 : vector<16x1xf32> to vector<16x256xf32>
    %218 = arith.mulf %217, %216 : vector<16x256xf32>
    %219 = arith.addf %214, %218 : vector<16x256xf32>
    %220 = vector.extract_strided_slice %183 {offsets = [0, 7], sizes = [16, 1], strides = [1, 1]} : vector<16x9xf32> to vector<16x1xf32>
    %c1_i32_45 = arith.constant 1 : i32
    %221 = tpu.dynamic_rotate %182 by %c1_i32_45 dim 1 : vector<16x256xf32>, i32 -> vector<16x256xf32>
    %222 = vector.broadcast %220 : vector<16x1xf32> to vector<16x256xf32>
    %223 = arith.mulf %222, %221 : vector<16x256xf32>
    %224 = arith.addf %219, %223 : vector<16x256xf32>
    %225 = vector.extract_strided_slice %183 {offsets = [0, 8], sizes = [16, 1], strides = [1, 1]} : vector<16x9xf32> to vector<16x1xf32>
    %226 = vector.broadcast %225 : vector<16x1xf32> to vector<16x256xf32>
    %227 = arith.mulf %226, %182 : vector<16x256xf32>
    %228 = arith.addf %224, %227 : vector<16x256xf32>
    %cst_46 = arith.constant dense<0.000000e+00> : vector<256xf32>
    %229 = vector.multi_reduction <add>, %228, %cst_46 [0] : vector<16x256xf32> to vector<256xf32>
    %230 = vector.shape_cast %229 : vector<256xf32> to vector<1x256xf32>
    %c0_47 = arith.constant 0 : index
    %c0_48 = arith.constant 0 : index
    %231 = vector.load %arg9[%c0_47, %c0_48] : memref<1x1xf32, #tpu.memory_space<vmem>>, vector<1x1xf32>
    %232 = vector.broadcast %231 : vector<1x1xf32> to vector<1x256xf32>
    %233 = arith.addf %230, %232 : vector<1x256xf32>
    %234 = math.tanh %233 : vector<1x256xf32>
    %c0_49 = arith.constant 0 : index
    %c0_50 = arith.constant 0 : index
    %c0_51 = arith.constant 0 : index
    %235 = vector.load %arg12[%c0_49, %c0_50, %c0_51] : memref<1x1x256xf32, #tpu.memory_space<vmem>>, vector<1x1x256xf32>
    %236 = vector.shape_cast %235 : vector<1x1x256xf32> to vector<1x256xf32>
    %237 = vector.shape_cast %234 : vector<1x256xf32> to vector<1x1x256xf32>
    tpu.vector_store %arg12[%c0_49, %c0_50, %c0_51], %237 {strides = array<i32>} : memref<1x1x256xf32, #tpu.memory_space<vmem>>, vector<1x1x256xf32>,
    return
  }
  func.func @transform_0(%arg0: i32) -> (i32, i32, i32) {
    %c0_i32 = arith.constant 0 : i32
    %c0_i32_0 = arith.constant 0 : i32
    %c0_i32_1 = arith.constant 0 : i32
    return %arg0, %c0_i32, %c0_i32_0 : i32, i32, i32
  }
  func.func @transform_1(%arg0: i32) -> (i32, i32) {
    %c0_i32 = arith.constant 0 : i32
    %c0_i32_0 = arith.constant 0 : i32
    %c0_i32_1 = arith.constant 0 : i32
    return %c0_i32, %c0_i32_0 : i32, i32
  }
  func.func @transform_2(%arg0: i32) -> (i32, i32) {
    %c0_i32 = arith.constant 0 : i32
    %c0_i32_0 = arith.constant 0 : i32
    %c0_i32_1 = arith.constant 0 : i32
    return %c0_i32, %c0_i32_0 : i32, i32
  }
  func.func @transform_3(%arg0: i32) -> (i32, i32) {
    %c0_i32 = arith.constant 0 : i32
    %c0_i32_0 = arith.constant 0 : i32
    %c0_i32_1 = arith.constant 0 : i32
    return %c0_i32, %c0_i32_0 : i32, i32
  }
  func.func @transform_4(%arg0: i32) -> (i32, i32) {
    %c0_i32 = arith.constant 0 : i32
    %c0_i32_0 = arith.constant 0 : i32
    %c0_i32_1 = arith.constant 0 : i32
    return %c0_i32, %c0_i32_0 : i32, i32
  }
  func.func @transform_5(%arg0: i32) -> (i32, i32) {
    %c0_i32 = arith.constant 0 : i32
    %c0_i32_0 = arith.constant 0 : i32
    %c0_i32_1 = arith.constant 0 : i32
    return %c0_i32, %c0_i32_0 : i32, i32
  }
  func.func @transform_6(%arg0: i32) -> (i32, i32) {
    %c0_i32 = arith.constant 0 : i32
    %c0_i32_0 = arith.constant 0 : i32
    %c0_i32_1 = arith.constant 0 : i32
    return %c0_i32, %c0_i32_0 : i32, i32
  }
  func.func @transform_7(%arg0: i32) -> (i32, i32) {
    %c0_i32 = arith.constant 0 : i32
    %c0_i32_0 = arith.constant 0 : i32
    %c0_i32_1 = arith.constant 0 : i32
    return %c0_i32, %c0_i32_0 : i32, i32
  }
  func.func @transform_8(%arg0: i32) -> (i32, i32) {
    %c0_i32 = arith.constant 0 : i32
    %c0_i32_0 = arith.constant 0 : i32
    %c0_i32_1 = arith.constant 0 : i32
    return %c0_i32, %c0_i32_0 : i32, i32
  }
  func.func @transform_9(%arg0: i32) -> (i32, i32) {
    %c0_i32 = arith.constant 0 : i32
    %c0_i32_0 = arith.constant 0 : i32
    %c0_i32_1 = arith.constant 0 : i32
    return %c0_i32, %c0_i32_0 : i32, i32
  }
  func.func @transform_10(%arg0: i32) -> (i32, i32) {
    %c0_i32 = arith.constant 0 : i32
    %c0_i32_0 = arith.constant 0 : i32
    %c0_i32_1 = arith.constant 0 : i32
    return %c0_i32, %c0_i32_0 : i32, i32
  }
  func.func @transform_11(%arg0: i32) -> (i32, i32, i32) {
    %c0_i32 = arith.constant 0 : i32
    %c0_i32_0 = arith.constant 0 : i32
    %c0_i32_1 = arith.constant 0 : i32
    return %arg0, %c0_i32, %c0_i32_0 : i32, i32, i32
  }
  func.func @transform_12(%arg0: i32) -> (i32, i32, i32) {
    %c0_i32 = arith.constant 0 : i32
    %c0_i32_0 = arith.constant 0 : i32
    %c0_i32_1 = arith.constant 0 : i32
    return %arg0, %c0_i32, %c0_i32_0 : i32, i32, i32
  }
}

</mosaic_0001>

<bundles_post_ra>
// kernel: autoencoder_forward.1
= control target key start
LH: loop header
LB: loop body
LE: loop exit
PB: predicated region body
PF: predicated region fallthrough
CT: control target
= control target key end

     0   :  { %s1938_s25 = smov 0   ;;  %s2933_s0 = inlined_call_operand.vmem [shape: f32[2,1,256], index: 0, kind: input, shape index: {}]   ;;  %s2934_s1 = inlined_call_operand.vmem [shape: f32[16,9], index: 1, kind: input, shape index: {}]   ;;  %s2935_s2 = inlined_call_operand.vmem [shape: f32[16,1], index: 2, kind: input, shape index: {}]   ;;  %s2936_s3 = inlined_call_operand.vmem [shape: f32[16,9], index: 3, kind: input, shape index: {}]   ;;  %s2937_s4 = inlined_call_operand.<no memory space> [shape: f32[1,1], index: 4, kind: input, shape index: {}]   ;;  %s2938_s5 = inlined_call_operand.vmem [shape: f32[16,9], index: 5, kind: input, shape index: {}]   ;;  %s2939_s6 = inlined_call_operand.vmem [shape: f32[16,1], index: 6, kind: input, shape index: {}]   ;;  %s2940_s7 = inlined_call_operand.vmem [shape: f32[16,9], index: 7, kind: input, shape index: {}]   ;;  %s2941_s9 = inlined_call_operand.vmem [shape: f32[1,256], index: 9, kind: input, shape index: {}]   ;;  %s2942_s10 = inlined_call_operand.vmem [shape: f32[1,256], index: 10, kind: input, shape index: {}]   ;;  %s2943_s11 = inlined_call_operand.vmem [shape: f32[2,1,256], index: 11, kind: output, shape index: {0}]   ;;  %s2944_s12 = inlined_call_operand.vmem [shape: f32[2,1,256], index: 12, kind: output, shape index: {1}]   ;;  %s2945_s8 = inlined_call_operand.<no memory space> [shape: f32[1,1], index: 8, kind: input, shape index: {}]  }
   0x1   :  { %v18_v0 = vstv %s2937_s4  ;;  %v20_v1 = vstv %s2945_s8 }
   0x2   :  { %19 = vst [vmem:[#allocation2] sm:$0x1] %v18_v0  ;;  %21 = vst [vmem:[#allocation3] sm:$0x1] %v20_v1 }
   0x3 LB: > { %s1722_s26 = sadd.s32 4294967295, %s1839_s25   ;;  %p1726_p0 = scmp.ge.s32.totalorder %s1839_s25, 1  ;;  %s1839_s25 = sphi %s1938_s25, %s27_s25  }
   0x4   : > { %p368_p1 = scmp.lt.s32.totalorder %s1839_s25, 3 }
   0x6   : > { %p369_p2 = pnand %p1726_p0, %p368_p1 }
   0x7   : > { %p412_p3 = scmp.lt.s32.totalorder (!%p369_p2), %s1722_s26, 1  ;;  %s1844_s13 = smov (!%p369_p2), 126  }
   0x8   : > { %372 = sbr.rel (%p369_p2) target bundleno = 894 (0x37e), region = 64  ;;  %s1845_s14 = smov (!%p369_p2), 127  }
   0x9   : > { %s1846_s17 = smov (!%p369_p2), 111   ;;  %s1848_s18 = smov (!%p369_p2), 96  }
   0xa   : > { %s1849_s19 = smov (!%p369_p2), 112   ;;  %s1851_s20 = smov (!%p369_p2), 94  }
   0xb   : > { %s1855_s21 = smov (!%p369_p2), 110   ;;  %s1857_s4 = smov (!%p369_p2), 95  }
   0xc   : > { %s1859_s27 = smov (!%p369_p2), 34   ;;  %s1862_s15 = smov (!%p369_p2), 18  }
   0xd   : > { %v1949_v2 = vld [vmem:[%s2934_s1 + $0x8] sm:$0xff]  ;;  %v440_v3 = vlaneseq  ;;  %v1841_v4 = vmov 1   ;;  %v2946_v5 = vmov 3   ;;  %s2969_s26 = smov (!%p412_p3, %s1722_s26), 1  ;;  %v1843_v10 = vmov 2   ;;  %v427_v13 = vld [vmem:[%s2934_s1] sm:$0xff] }
   0xe   : > { %1766 = vset.pattern.permute.xlu1 %v1841_v4  ;;  %1768 = vset.pattern.permute.xlu0 %v2946_v5  ;;  %s1957_s8 = sshll.u32 %s2969_s26, 1  ;;  %v2953_v14 = vmov 6   ;;  %v2951_v15 = vmov 7   ;;  %v2949_v16 = vmov 8   ;;  %v2957_v17 = vmov 4   ;;  %v2015_v20 = vld [vmem:[%s2936_s3] sm:$0xff] }
   0xf   : > { %472 = vperm.xlu1 %1766, %v1949_v2   ;;  %v1955_v6 = vshrl.u32 %v440_v3, 7  ;;  %s415_s30 = scalar_lea.vmem %s2933_s0, %s1957_s8  ;;  %v2947_v18 = vmov 0   ;;  %v2955_v19 = vmov 5   ;;  %v2027_v21 = vld [vmem:[%s2936_s3 + $0x8] sm:$0xff]  ;;  %v708_v22 = vld [vmem:[%s2935_s2] sm:$0xff]  ;;  %v2085_v47 = vand.u32 127, %v440_v3  ;;  %s419_s24 = scalar_lea.vmem %s2943_s11, %s1957_s8 }
  0x10   : > { %v424_v9 = vld [vmem:[%s415_s30] sm:$0x3]  ;;  %v709_v23 = vld [vmem:[%s2935_s2 + $0x8] sm:$0xff]  ;;  %s423_s30 = scalar_lea.vmem %s2944_s12, %s1957_s8  ;;  %vm2525_vm8 = vcmp.lt.s32.totalorder %v440_v3, 256  ;;  %s1863_s16 = smov 2  }
  0x11   : > { %v1960_v7 = vsub.s32 0, %v1955_v6  ;;  %v1963_v8 = vsub.s32 1, %v1955_v6  ;;  %vm464_vm0 = vcmp.lt.s32.totalorder %v2085_v47, 127  ;;  %vm495_vm1 = vcmp.lt.s32.totalorder %v2085_v47, 126 }
  0x12   : > { %vm526_vm2 = vcmp.lt.s32.totalorder %v2085_v47, 112  ;;  %vm557_vm3 = vcmp.lt.s32.totalorder %v2085_v47, 111  ;;  %vm588_vm4 = vcmp.lt.s32.totalorder %v2085_v47, 110  ;;  %vm619_vm5 = vcmp.lt.s32.totalorder %v2085_v47, 96 }
  0x13   : > { %1767 = vset.pattern.permute.xlu1 %v1843_v10  ;;  %v1971_v11 = vrot.slane %v424_v9, %v1963_v8  ;;  %v1974_v12 = vrot.slane %v424_v9, %v1960_v7  ;;  %vm650_vm6 = vcmp.lt.s32.totalorder %v2085_v47, 95  ;;  %vm681_vm7 = vcmp.lt.s32.totalorder %v2085_v47, 94 }
  0x14   : > { %vm1075_vm9 = vcmp.lt.s32.totalorder %v2085_v47, 33  ;;  %vm1042_vm10 = vcmp.lt.s32.totalorder %v2085_v47, 34  ;;  %vm1106_vm11 = vcmp.lt.s32.totalorder %v2085_v47, 32  ;;  %vm1137_vm12 = vcmp.lt.s32.totalorder %v2085_v47, 18 }
  0x15   : > { %493 = vrot.lane.b32.xlu0 %v1971_v11, %s1844_s13  ;;  %458 = vrot.lane.b32.xlu1 %v1974_v12, %s1845_s14  ;;  %vm1168_vm13 = vcmp.lt.s32.totalorder %v2085_v47, 17  ;;  %vm1199_vm14 = vcmp.lt.s32.totalorder %v2085_v47, 16  ;;  %vm1230_vm15 = vcmp.lt.s32.totalorder %v2085_v47, 2 }
  0x19   : > { %530 = vperm.xlu0 %1768, %v427_v13   ;;  %460 = vrot.lane.b32.xlu1 %v1971_v11, %s1845_s14 }
  0x1d   : > { %555 = vrot.lane.b32.xlu0 %v1971_v11, %s1846_s17  ;;  %491 = vrot.lane.b32.xlu1 %v1974_v12, %s1844_s13 }
  0x1e   : > { %1773 = vset.pattern.permute.xlu0 %v2953_v14 }
  0x21   : > { %617 = vrot.lane.b32.xlu0 %v1971_v11, %s1848_s18  ;;  %499 = vperm.xlu1 %1767, %v427_v13  }
  0x25   : > { %627 = vperm.xlu0 %1773, %v1949_v2   ;;  %522 = vrot.lane.b32.xlu1 %v1974_v12, %s1849_s19 }
  0x26   : > { %1769 = vset.pattern.permute.xlu1 %v2946_v5 }
  0x29   : > { %1774 = vset.pattern.permute.xlu0 %v2951_v15  ;;  %524 = vrot.lane.b32.xlu1 %v1971_v11, %s1849_s19 }
  0x2a   : > { %654 = vperm.xlu0 %1774, %v427_v13  }
  0x2d   : > { %534 = vperm.xlu1 %1769, %v1949_v2  }
  0x2e   : > { %679 = vrot.lane.b32.xlu0 %v1971_v11, %s1851_s20 }
  0x2f   : > { %1777 = vset.pattern.permute.xlu0 %v2949_v16 }
  0x31   : > { %553 = vrot.lane.b32.xlu1 %v1974_v12, %s1846_s17 }
  0x32   : > { %689 = vperm.xlu0 %1777, %v1949_v2   ;;  %1770 = vset.pattern.permute.xlu1 %v2957_v17 }
  0x35   : > { %561 = vperm.xlu1 %1770, %v427_v13  }
  0x36   : > { %1778 = vset.pattern.permute.xlu0 %v2947_v18 }
  0x37   : > { %431 = vperm.xlu0 %1778, %v427_v13  }
  0x39   : > { %584 = vrot.lane.b32.xlu1 %v1974_v12, %s1855_s21 }
  0x3a   : > { %1771 = vset.pattern.permute.xlu1 %v2955_v19 }
  0x3b   : > { %436 = vperm.xlu0 %1778, %v1949_v2  }
  0x3d   : > { %586 = vrot.lane.b32.xlu1 %v1971_v11, %s1855_s21 }
  0x3f   : > { %732 = vperm.xlu0 %1778, %v2015_v20  }
  0x41   : > { %596 = vperm.xlu1 %1771, %v1949_v2  }
  0x43   : > { %1780 = vset.pattern.permute.xlu0 %v1841_v4 }
  0x44   : > { %468 = vperm.xlu0 %1780, %v427_v13  }
  0x45   : > { %615 = vrot.lane.b32.xlu1 %v1974_v12, %s1848_s18 }
  0x46   : > { %1772 = vset.pattern.permute.xlu1 %v2953_v14 }
  0x48   : > { %765 = vperm.xlu0 %1780, %v2027_v21  }
  0x49   : > { %623 = vperm.xlu1 %1772, %v427_v13  }
  0x4c   : > { %1782 = vset.pattern.permute.xlu0 %v1843_v10 }
  0x4d   : > { %503 = vperm.xlu0 %1782, %v1949_v2   ;;  %646 = vrot.lane.b32.xlu1 %v1974_v12, %s1857_s4 }
  0x4e   : > { %1775 = vset.pattern.permute.xlu1 %v2951_v15 }
  0x51   : > { %789 = vperm.xlu0 %1782, %v2015_v20   ;;  %648 = vrot.lane.b32.xlu1 %v1971_v11, %s1857_s4 }
  0x55   : > { %1783 = vset.pattern.permute.xlu0 %v2957_v17  ;;  %658 = vperm.xlu1 %1775, %v1949_v2  }
  0x56   : > { %565 = vperm.xlu0 %1783, %v1949_v2  }
  0x59   : > { %677 = vrot.lane.b32.xlu1 %v1974_v12, %s1851_s20 }
  0x5a   : > { %845 = vperm.xlu0 %1783, %v2015_v20   ;;  %1776 = vset.pattern.permute.xlu1 %v2949_v16 }
  0x5d   : > { %685 = vperm.xlu1 %1776, %v427_v13  }
  0x5e   : > { %1786 = vset.pattern.permute.xlu0 %v2955_v19 }
  0x5f   : > { %592 = vperm.xlu0 %1786, %v427_v13  }
  0x61   : > { %1779 = vset.pattern.permute.xlu1 %v2947_v18 }
  0x62   : > { %712 = vperm.xlu1 %1779, %v708_v22  }
  0x66   : > { %717 = vperm.xlu1 %1779, %v709_v23  }
  0x6a   : > { %737 = vperm.xlu1 %1779, %v2027_v21  }
  0x6e   : > { %1781 = vset.pattern.permute.xlu1 %v1841_v4 }
  0x6f   : > { %761 = vperm.xlu1 %1781, %v2015_v20  }
  0x73   : > { %1784 = vset.pattern.permute.xlu1 %v1843_v10 }
  0x74   : > { %793 = vperm.xlu1 %1784, %v2027_v21  }
  0x78   : > { %1785 = vset.pattern.permute.xlu1 %v2946_v5 }
  0x79   : > { %817 = vperm.xlu1 %1785, %v2015_v20  }
  0x7d   : > { %1787 = vset.pattern.permute.xlu1 %v2957_v17 }
  0x7e   : > { %849 = vperm.xlu1 %1787, %v2027_v21  }
  0x82   : > { %1788 = vset.pattern.permute.xlu1 %v2955_v19 }
  0x87   : > { %v494_v26 = vpop.permute.xlu0 %493 }
  0x8a   : > { %v473_v24 = vpop.permute.xlu1 %472 }
  0x8e   : > { %v459_v25 = vpop.permute.xlu1 %458 }
  0x92   : > { %v461_v27 = vpop.permute.xlu1 %460 }
  0x93   : > { %v465_v51 = vsel %vm464_vm0, %v459_v25, %v461_v27  ;;  %v466_v52 = vsel %vm464_vm0, %v461_v27, %v459_v25 }
  0x94   : > { %v2064_v28 = vpop.permute.xlu0 %530  ;;  %v478_v57 = vrot.slane %v465_v51, %v1960_v7  ;;  %v482_v58 = vrot.slane %v466_v52, %v1960_v7 }
  0x96   : > { %v492_v29 = vpop.permute.xlu1 %491  ;;  %v485_v9 = vmul.f32 %v478_v57, %v473_v24  ;;  %v486_v13 = vmul.f32 %v482_v58, %v473_v24 }
  0x97   : > { %v496_v54 = vsel %vm495_vm1, %v492_v29, %v494_v26  ;;  %v497_v55 = vsel %vm495_vm1, %v494_v26, %v492_v29 }
  0x98   : > { %v556_v30 = vpop.permute.xlu0 %555  ;;  %v509_v59 = vrot.slane %v496_v54, %v1960_v7  ;;  %v513_v60 = vrot.slane %v497_v55, %v1960_v7 }
  0x9c   : > { %v2066_v31 = vpop.permute.xlu0 %617  ;;  %v2068_v32 = vpop.permute.xlu1 %499 }
  0xa0   : > { %v2070_v33 = vpop.permute.xlu0 %627  ;;  %v523_v34 = vpop.permute.xlu1 %522 }
  0xa4   : > { %v525_v35 = vpop.permute.xlu1 %524 }
  0xa5   : > { %v2072_v36 = vpop.permute.xlu0 %654  ;;  %v527_v61 = vsel %vm526_vm2, %v523_v34, %v525_v35  ;;  %v528_v62 = vsel %vm526_vm2, %v525_v35, %v523_v34 }
  0xa6   : > { %v540_v25 = vrot.slane %v527_v61, %v1960_v7  ;;  %v544_v26 = vrot.slane %v528_v62, %v1960_v7 }
  0xa8   : > { %v2074_v37 = vpop.permute.xlu1 %534 }
  0xa9   : > { %v2076_v38 = vpop.permute.xlu0 %679 }
  0xac   : > { %v554_v39 = vpop.permute.xlu1 %553 }
  0xad   : > { %v2078_v40 = vpop.permute.xlu0 %689  ;;  %v558_v34 = vsel %vm557_vm3, %v554_v39, %v556_v30  ;;  %v559_v24 = vsel %vm557_vm3, %v556_v30, %v554_v39 }
  0xb0   : > { %v2080_v41 = vpop.permute.xlu1 %561 }
  0xb2   : > { %v432_v42 = vpop.permute.xlu0 %431 }
  0xb3   : > { %v450_v55 = vmul.f32 %v1974_v12, %v432_v42  ;;  %v451_v61 = vmul.f32 %v1971_v11, %v432_v42  ;;  %v575_v42 = vrot.slane %v559_v24, %v1960_v7 }
  0xb4   : > { %v585_v43 = vpop.permute.xlu1 %584 }
  0xb6   : > { %v437_v44 = vpop.permute.xlu0 %436 }
  0xb7   : > { %v452_v63 = vmul.f32 %v1974_v12, %v437_v44  ;;  %v453_v0 = vmul.f32 %v1971_v11, %v437_v44  ;;  %v548_v12 = vmul.f32 %v544_v26, %v2074_v37  ;;  %v571_v11 = vrot.slane %v558_v34, %v1960_v7 }
  0xb8   : > { %v587_v45 = vpop.permute.xlu1 %586 }
  0xb9   : > { %v489_v35 = vadd.f32 %v485_v9, %v452_v63  ;;  %v490_v44 = vadd.f32 %v486_v13, %v453_v0  ;;  %v589_v51 = vsel %vm588_vm4, %v585_v43, %v587_v45  ;;  %v547_v63 = vmul.f32 %v540_v25, %v2074_v37 }
  0xba   : > { %v2082_v46 = vpop.permute.xlu0 %732  ;;  %v602_v0 = vrot.slane %v589_v51, %v1960_v7  ;;  %v515_v9 = vmul.f32 %v513_v60, %v2068_v32 }
  0xbc   : > { %v2087_v48 = vpop.permute.xlu1 %596 }
  0xbf   : > { %v469_v49 = vpop.permute.xlu0 %468 }
  0xc0   : > { %v616_v50 = vpop.permute.xlu1 %615  ;;  %v483_v27 = vmul.f32 %v478_v57, %v469_v49  ;;  %v484_v29 = vmul.f32 %v482_v58, %v469_v49  ;;  %v590_v49 = vsel %vm588_vm4, %v587_v45, %v585_v43 }
  0xc1   : > { %v620_v57 = vsel %vm619_vm5, %v616_v50, %v2066_v31  ;;  %v606_v43 = vrot.slane %v590_v49, %v1960_v7  ;;  %v621_v13 = vsel %vm619_vm5, %v2066_v31, %v616_v50 }
  0xc2   : > { %v487_v30 = vadd.f32 %v483_v27, %v450_v55  ;;  %v488_v39 = vadd.f32 %v484_v29, %v451_v61  ;;  %v545_v55 = vmul.f32 %v540_v25, %v2064_v28  ;;  %v546_v61 = vmul.f32 %v544_v26, %v2064_v28 }
  0xc3   : > { %v2095_v53 = vpop.permute.xlu0 %765 }
  0xc4   : > { %v2101_v56 = vpop.permute.xlu1 %623  ;;  %v519_v51 = vadd.f32 %v515_v9, %v488_v39 }
  0xc8   : > { %v504_v1 = vpop.permute.xlu0 %503  ;;  %v647_v2 = vpop.permute.xlu1 %646 }
  0xc9   : > { %v516_v22 = vmul.f32 %v509_v59, %v504_v1  ;;  %v517_v23 = vmul.f32 %v513_v60, %v504_v1  ;;  %v514_v1 = vmul.f32 %v509_v59, %v2068_v32  ;;  %v610_v32 = vmul.f32 %v606_v43, %v2087_v48 }
  0xca   : > { %v637_v60 = vrot.slane %v621_v13, %v1960_v7 }
  0xcb   : > { %v520_v58 = vadd.f32 %v516_v22, %v489_v35  ;;  %v521_v62 = vadd.f32 %v517_v23, %v490_v44  ;;  %v633_v22 = vrot.slane %v620_v57, %v1960_v7  ;;  %v609_v35 = vmul.f32 %v602_v0, %v2087_v48 }
  0xcc   : > { %v2124_v52 = vpop.permute.xlu0 %789  ;;  %v649_v54 = vpop.permute.xlu1 %648  ;;  %v518_v44 = vadd.f32 %v514_v1, %v487_v30  ;;  %v641_v25 = vmul.f32 %v637_v60, %v2070_v33  ;;  %v577_v1 = vmul.f32 %v575_v42, %v2080_v41 }
  0xcd   : > { %v551_v27 = vadd.f32 %v547_v63, %v520_v58  ;;  %v552_v37 = vadd.f32 %v548_v12, %v521_v62  ;;  %v651_v59 = vsel %vm650_vm6, %v647_v2, %v649_v54  ;;  %v652_v49 = vsel %vm650_vm6, %v649_v54, %v647_v2 }
  0xce   : > { %v640_v58 = vmul.f32 %v633_v22, %v2070_v33  ;;  %v664_v62 = vrot.slane %v651_v59, %v1960_v7  ;;  %v549_v39 = vadd.f32 %v545_v55, %v518_v44  ;;  %v550_v12 = vadd.f32 %v546_v61, %v519_v51 }
  0xcf   : > { %v668_v28 = vrot.slane %v652_v49, %v1960_v7  ;;  %v576_v54 = vmul.f32 %v571_v11, %v2080_v41  ;;  %v639_v41 = vmul.f32 %v637_v60, %v2101_v56 }
  0xd0   : > { %v659_v45 = vpop.permute.xlu1 %658 }
  0xd1   : > { %v566_v23 = vpop.permute.xlu0 %565  ;;  %v671_v13 = vmul.f32 %v664_v62, %v659_v45  ;;  %v672_v44 = vmul.f32 %v668_v28, %v659_v45  ;;  %v670_v55 = vmul.f32 %v668_v28, %v2072_v36 }
  0xd2   : > { %v578_v29 = vmul.f32 %v571_v11, %v566_v23  ;;  %v579_v34 = vmul.f32 %v575_v42, %v566_v23  ;;  %v638_v11 = vmul.f32 %v633_v22, %v2101_v56 }
  0xd4   : > { %v582_v24 = vadd.f32 %v578_v29, %v551_v27  ;;  %v583_v31 = vadd.f32 %v579_v34, %v552_v37  ;;  %v678_v50 = vpop.permute.xlu1 %677  ;;  %v580_v29 = vadd.f32 %v576_v54, %v549_v39  ;;  %v581_v34 = vadd.f32 %v577_v1, %v550_v12  ;;  %v2265_v54 = vld [vmem:[%s2938_s5] sm:$0xff] }
  0xd5   : > { %v2157_v57 = vpop.permute.xlu0 %845  ;;  %v682_v30 = vsel %vm681_vm7, %v678_v50, %v2076_v38  ;;  %v683_v9 = vsel %vm681_vm7, %v2076_v38, %v678_v50  ;;  %v669_v50 = vmul.f32 %v664_v62, %v2072_v36  ;;  %v986_v1 = vld [vmem:[#allocation2] sm:$0x1] }
  0xd6   : > { %v613_v63 = vadd.f32 %v609_v35, %v582_v24  ;;  %v614_v48 = vadd.f32 %v610_v32, %v583_v31  ;;  %v695_v23 = vrot.slane %v682_v30, %v1960_v7  ;;  %v699_v51 = vrot.slane %v683_v9, %v1960_v7 }
  0xd8   : > { %v686_v26 = vpop.permute.xlu1 %685  ;;  %v644_v2 = vadd.f32 %v640_v58, %v613_v63  ;;  %v645_v37 = vadd.f32 %v641_v25, %v614_v48  ;;  %v702_v24 = vmul.f32 %v695_v23, %v2078_v40  ;;  %v703_v45 = vmul.f32 %v699_v51, %v2078_v40 }
  0xd9   : > { %v700_v49 = vmul.f32 %v695_v23, %v686_v26  ;;  %v701_v58 = vmul.f32 %v699_v51, %v686_v26 }
  0xda   : > { %v593_v27 = vpop.permute.xlu0 %592  ;;  %v675_v59 = vadd.f32 %v671_v13, %v644_v2  ;;  %v676_v31 = vadd.f32 %v672_v44, %v645_v37  ;;  %v2256_v2 = vld [vmem:[%s2938_s5 + $0x8] sm:$0xff] }
  0xdb   : > { %v607_v33 = vmul.f32 %v602_v0, %v593_v27  ;;  %v608_v35 = vmul.f32 %v606_v43, %v593_v27  ;;  %v1313_v13 = vld [vmem:[%s2939_s6 + $0x8] sm:$0xff]  ;;  %v2306_v27 = vld [vmem:[%s2940_s7] sm:$0xff] }
  0xdc   : > { %v706_v61 = vadd.f32 %v702_v24, %v675_v59  ;;  %v707_v60 = vadd.f32 %v703_v45, %v676_v31  ;;  %v1312_v31 = vld [vmem:[%s2939_s6] sm:$0xff] }
  0xdd   : > { %v611_v42 = vadd.f32 %v607_v33, %v580_v29  ;;  %v612_v32 = vadd.f32 %v608_v35, %v581_v34  ;;  %v713_v38 = vpop.permute.xlu1 %712 }
  0xdf   : > { %v642_v0 = vadd.f32 %v638_v11, %v611_v42  ;;  %v643_v43 = vadd.f32 %v639_v41, %v612_v32 }
  0xe1   : > { %v674_v22 = vadd.f32 %v670_v55, %v643_v43  ;;  %v673_v63 = vadd.f32 %v669_v50, %v642_v0  ;;  %v718_v56 = vpop.permute.xlu1 %717  ;;  %v2336_v50 = vld [vmem:[%s2940_s7 + $0x8] sm:$0xff] }
  0xe2   : > { %v722_v48 = vadd.f32 %v718_v56, %v706_v61  ;;  %v723_v12 = vadd.f32 %v718_v56, %v707_v60 }
  0xe3   : > { %v705_v30 = vadd.f32 %v701_v58, %v674_v22  ;;  %v704_v39 = vadd.f32 %v700_v49, %v673_v63 }
  0xe4   : > { %v2179_v25 = vmax.f32 %v722_v48, 0.0  ;;  %v2185_v40 = vmax.f32 %v723_v12, 0.0 }
  0xe5   : > { %v720_v62 = vadd.f32 %v713_v38, %v704_v39  ;;  %v721_v36 = vadd.f32 %v713_v38, %v705_v30 }
  0xe6   : > { %750 = vrot.lane.b32.xlu0 %v2179_v25, %s1845_s14 }
  0xe7   : > { %v2183_v28 = vmax.f32 %v720_v62, 0.0  ;;  %v2191_v26 = vmax.f32 %v721_v36, 0.0 }
  0xe9   : > { %748 = vrot.lane.b32.xlu1 %v2183_v28, %s1845_s14 }
  0xea   : > { %754 = vrot.lane.b32.xlu0 %v2185_v40, %s1845_s14 }
  0xed   : > { %752 = vrot.lane.b32.xlu1 %v2191_v26, %s1845_s14  ;;  %s1861_s14 = smov 32  }
  0xee   : > { %780 = vrot.lane.b32.xlu0 %v2191_v26, %s1844_s13 }
  0xf1   : > { %776 = vrot.lane.b32.xlu1 %v2183_v28, %s1844_s13 }
  0xf2   : > { %806 = vrot.lane.b32.xlu0 %v2179_v25, %s1849_s19 }
  0xf5   : > { %778 = vrot.lane.b32.xlu1 %v2179_v25, %s1844_s13 }
  0xf6   : > { %810 = vrot.lane.b32.xlu0 %v2185_v40, %s1849_s19 }
  0xf9   : > { %782 = vrot.lane.b32.xlu1 %v2185_v40, %s1844_s13  ;;  %s1860_s13 = smov 33  }
  0xfa   : > { %836 = vrot.lane.b32.xlu0 %v2191_v26, %s1846_s17 }
  0xfd   : > { %804 = vrot.lane.b32.xlu1 %v2183_v28, %s1849_s19 }
  0xfe   : > { %862 = vrot.lane.b32.xlu0 %v2179_v25, %s1855_s21 }
 0x101   : > { %808 = vrot.lane.b32.xlu1 %v2191_v26, %s1849_s19  ;;  %s1866_s19 = smov 1  }
 0x102   : > { %866 = vrot.lane.b32.xlu0 %v2185_v40, %s1855_s21 }
 0x105   : > { %832 = vrot.lane.b32.xlu1 %v2183_v28, %s1846_s17 }
 0x106   : > { %877 = vperm.xlu0 %1786, %v2027_v21  }
 0x109   : > { %834 = vrot.lane.b32.xlu1 %v2179_v25, %s1846_s17 }
 0x10a   : > { %892 = vrot.lane.b32.xlu0 %v2191_v26, %s1848_s18 }
 0x10b   : > { %1789 = vset.pattern.permute.xlu0 %v2953_v14 }
 0x10d   : > { %838 = vrot.lane.b32.xlu1 %v2185_v40, %s1846_s17  ;;  %s1864_s17 = smov 17  }
 0x10e   : > { %901 = vperm.xlu0 %1789, %v2015_v20  }
 0x111   : > { %860 = vrot.lane.b32.xlu1 %v2183_v28, %s1855_s21 }
 0x112   : > { %1791 = vset.pattern.permute.xlu0 %v2951_v15 }
 0x113   : > { %929 = vperm.xlu0 %1791, %v2015_v20  }
 0x115   : > { %864 = vrot.lane.b32.xlu1 %v2191_v26, %s1855_s21 }
 0x117   : > { %1794 = vset.pattern.permute.xlu0 %v2949_v16 }
 0x118   : > { %961 = vperm.xlu0 %1794, %v2027_v21  }
 0x119   : > { %873 = vperm.xlu1 %1788, %v2015_v20  }
 0x11c   : > { %1795 = vset.pattern.permute.xlu0 %v2946_v5 }
 0x11d   : > { %821 = vperm.xlu0 %1795, %v2027_v21   ;;  %888 = vrot.lane.b32.xlu1 %v2183_v28, %s1848_s18 }
 0x11e   : > { %1790 = vset.pattern.permute.xlu1 %v2953_v14 }
 0x121   : > { %922 = vrot.lane.b32.xlu0 %v2185_v40, %s1857_s4  ;;  %890 = vrot.lane.b32.xlu1 %v2179_v25, %s1848_s18 }
 0x125   : > { %946 = vrot.lane.b32.xlu0 %v2179_v25, %s1851_s20  ;;  %894 = vrot.lane.b32.xlu1 %v2185_v40, %s1848_s18  ;;  %s1865_s18 = smov 16  }
 0x129   : > { %950 = vrot.lane.b32.xlu0 %v2185_v40, %s1851_s20  ;;  %905 = vperm.xlu1 %1790, %v2027_v21  }
 0x12d   : > { %916 = vrot.lane.b32.xlu1 %v2183_v28, %s1857_s4  ;;  %1145 = vperm.xlu0 %1795, %v2256_v2  }
 0x12e   : > { %1792 = vset.pattern.permute.xlu1 %v2951_v15 }
 0x131   : > { %933 = vperm.xlu1 %1792, %v2027_v21   ;;  %1800 = vset.pattern.permute.xlu0 %v2957_v17  ;;  %v2281_v21 = vpop.permute.xlu1 %737 }
 0x132   : > { %1172 = vperm.xlu0 %1800, %v2265_v54  }
 0x135   : > { %1793 = vset.pattern.permute.xlu1 %v2949_v16 }
 0x136   : > { %957 = vperm.xlu1 %1793, %v2015_v20   ;;  %1803 = vset.pattern.permute.xlu0 %v2955_v19  ;;  %v2287_v20 = vpop.permute.xlu1 %761 }
 0x137   : > { %1207 = vperm.xlu0 %1803, %v2256_v2  }
 0x13a   : > { %918 = vrot.lane.b32.xlu1 %v2179_v25, %s1857_s4  ;;  %v2293_v9 = vpop.permute.xlu1 %793 }
 0x13b   : > { %1796 = vset.pattern.permute.xlu1 %v2947_v18  ;;  %1804 = vset.pattern.permute.xlu0 %v2953_v14 }
 0x13c   : > { %1234 = vperm.xlu0 %1804, %v2265_v54  }
 0x13e   : > { %920 = vrot.lane.b32.xlu1 %v2191_v26, %s1857_s4  ;;  %v2301_v23 = vpop.permute.xlu1 %817 }
 0x140   : > { %1807 = vset.pattern.permute.xlu0 %v2951_v15 }
 0x141   : > { %1269 = vperm.xlu0 %1807, %v2256_v2  }
 0x142   : > { %944 = vrot.lane.b32.xlu1 %v2183_v28, %s1851_s20  ;;  %v2311_v37 = vpop.permute.xlu1 %849 }
 0x145   : > { %1808 = vset.pattern.permute.xlu0 %v2949_v16 }
 0x146   : > { %948 = vrot.lane.b32.xlu1 %v2191_v26, %s1851_s20  ;;  %1289 = vperm.xlu0 %1808, %v2265_v54  }
 0x14a   : > { %989 = vperm.xlu1 %1796, %v986_v1   ;;  %1809 = vset.pattern.permute.xlu0 %v2947_v18 }
 0x14b   : > { %1047 = vperm.xlu0 %1809, %v2265_v54  }
 0x14e   : > { %1052 = vperm.xlu1 %1796, %v2256_v2  }
 0x14f   : > { %1321 = vperm.xlu0 %1809, %v1313_v13  }
 0x152   : > { %1797 = vset.pattern.permute.xlu1 %v1841_v4 }
 0x153   : > { %1079 = vperm.xlu1 %1797, %v2265_v54   ;;  %1363 = vperm.xlu0 %1809, %v2306_v27  }
 0x157   : > { %1798 = vset.pattern.permute.xlu1 %v1843_v10  ;;  %1812 = vset.pattern.permute.xlu0 %v1841_v4 }
 0x158   : > { %1114 = vperm.xlu1 %1798, %v2256_v2   ;;  %1083 = vperm.xlu0 %1812, %v2256_v2   ;;  %v751_v34 = vpop.permute.xlu0 %750 }
 0x15b   : > { %v749_v29 = vpop.permute.xlu1 %748 }
 0x15c   : > { %1799 = vset.pattern.permute.xlu1 %v2946_v5  ;;  %v755_v44 = vpop.permute.xlu0 %754 }
 0x15d   : > { %1141 = vperm.xlu1 %1799, %v2265_v54   ;;  %v757_v36 = vsel %vm464_vm0, %v751_v34, %v755_v44 }
 0x15f   : > { %v753_v33 = vpop.permute.xlu1 %752 }
 0x160   : > { %v781_v59 = vpop.permute.xlu0 %780  ;;  %v756_v13 = vsel %vm464_vm0, %v749_v29, %v753_v33 }
 0x161   : > { %1801 = vset.pattern.permute.xlu1 %v2957_v17 }
 0x162   : > { %1176 = vperm.xlu1 %1801, %v2256_v2  }
 0x163   : > { %v777_v35 = vpop.permute.xlu1 %776 }
 0x164   : > { %v807_v42 = vpop.permute.xlu0 %806 }
 0x166   : > { %1802 = vset.pattern.permute.xlu1 %v2955_v19  ;;  %v768_v19 = vmul.f32 %v2287_v20, %v756_v13 }
 0x167   : > { %1203 = vperm.xlu1 %1802, %v2265_v54   ;;  %v779_v51 = vpop.permute.xlu1 %778 }
 0x168   : > { %v811_v38 = vpop.permute.xlu0 %810 }
 0x16b   : > { %1805 = vset.pattern.permute.xlu1 %v2953_v14  ;;  %v783_v11 = vpop.permute.xlu1 %782  ;;  %v743_v14 = vmul.f32 %v2281_v21, %v2185_v40  ;;  %v741_v40 = vmul.f32 %v2082_v46, %v2191_v26 }
 0x16c   : > { %1238 = vperm.xlu1 %1805, %v2256_v2   ;;  %v837_v55 = vpop.permute.xlu0 %836 }
 0x16f   : > { %v805_v41 = vpop.permute.xlu1 %804 }
 0x170   : > { %1806 = vset.pattern.permute.xlu1 %v2951_v15  ;;  %v2341_v43 = vpop.permute.xlu0 %862  ;;  %v742_v15 = vmul.f32 %v2281_v21, %v2179_v25  ;;  %v740_v21 = vmul.f32 %v2082_v46, %v2183_v28 }
 0x171   : > { %1265 = vperm.xlu1 %1806, %v2265_v54  }
 0x173   : > { %v809_v32 = vpop.permute.xlu1 %808 }
 0x174   : > { %v2344_v61 = vpop.permute.xlu0 %866 }
 0x175   : > { %1810 = vset.pattern.permute.xlu1 %v2949_v16 }
 0x176   : > { %1293 = vperm.xlu1 %1810, %v2256_v2   ;;  %v759_v2 = vsel %vm464_vm0, %v755_v44, %v751_v34  ;;  %v784_v34 = vsel %vm495_vm1, %v777_v35, %v781_v59  ;;  %v786_v44 = vsel %vm495_vm1, %v781_v59, %v777_v35 }
 0x177   : > { %v833_v24 = vpop.permute.xlu1 %832  ;;  %v771_v16 = vmul.f32 %v2095_v53, %v759_v2  ;;  %v796_v59 = vmul.f32 %v2124_v52, %v784_v34 }
 0x179   : > { %v775_v35 = vadd.f32 %v771_v16, %v743_v14  ;;  %v813_v14 = vsel %vm526_vm2, %v807_v42, %v811_v38  ;;  %v840_v16 = vsel %vm557_vm3, %v833_v24, %v837_v55 }
 0x17a   : > { %1811 = vset.pattern.permute.xlu1 %v2947_v18  ;;  %v770_v18 = vmul.f32 %v2095_v53, %v757_v36  ;;  %v787_v53 = vsel %vm495_vm1, %v783_v11, %v779_v51 }
 0x17b   : > { %1316 = vperm.xlu1 %1811, %v1312_v31   ;;  %v2338_v0 = vpop.permute.xlu1 %834  ;;  %v758_v31 = vsel %vm464_vm0, %v753_v33, %v749_v29  ;;  %v785_v33 = vsel %vm495_vm1, %v779_v51, %v783_v11  ;;  %v799_v13 = vmul.f32 %v2293_v9, %v787_v53  ;;  %v812_v51 = vsel %vm526_vm2, %v805_v41, %v809_v32 }
 0x17c   : > { %v769_v29 = vmul.f32 %v2287_v20, %v758_v31  ;;  %v774_v36 = vadd.f32 %v770_v18, %v742_v15  ;;  %v797_v20 = vmul.f32 %v2124_v52, %v786_v44  ;;  %v798_v2 = vmul.f32 %v2293_v9, %v785_v33 }
 0x17d   : > { %v814_v11 = vsel %vm526_vm2, %v809_v32, %v805_v41  ;;  %v772_v31 = vadd.f32 %v768_v19, %v740_v21  ;;  %v815_v15 = vsel %vm526_vm2, %v811_v38, %v807_v42  ;;  %v842_v18 = vsel %vm557_vm3, %v837_v55, %v833_v24 }
 0x17e   : > { %v773_v17 = vadd.f32 %v769_v29, %v741_v40  ;;  %v824_v9 = vmul.f32 %v2301_v23, %v812_v51  ;;  %v825_v19 = vmul.f32 %v2301_v23, %v814_v11  ;;  %v802_v34 = vadd.f32 %v798_v2, %v774_v36 }
 0x17f   : > { %1368 = vperm.xlu1 %1811, %v2336_v50   ;;  %v839_v45 = vpop.permute.xlu1 %838  ;;  %v800_v41 = vadd.f32 %v796_v59, %v772_v31  ;;  %v803_v44 = vadd.f32 %v799_v13, %v775_v35  ;;  %v852_v42 = vmul.f32 %v2157_v57, %v840_v16  ;;  %v853_v38 = vmul.f32 %v2157_v57, %v842_v18 }
 0x180   : > { %v801_v32 = vadd.f32 %v797_v20, %v773_v17  ;;  %v841_v24 = vsel %vm557_vm3, %v2338_v0, %v839_v45  ;;  %v869_v40 = vsel %vm588_vm4, %v2341_v43, %v2344_v61  ;;  %v871_v57 = vsel %vm588_vm4, %v2344_v61, %v2341_v43 }
 0x181   : > { %v2348_v58 = vpop.permute.xlu0 %877  ;;  %v828_v53 = vadd.f32 %v824_v9, %v800_v41  ;;  %v854_v21 = vmul.f32 %v2311_v37, %v841_v24  ;;  %vm1261_vm0 = vcmp.lt.s32.totalorder %v2085_v47, 1 }
 0x182   : > { %v829_v17 = vadd.f32 %v825_v19, %v801_v32  ;;  %v882_v31 = vmul.f32 %v2348_v58, %v869_v40 }
 0x183   : > { %1814 = vset.pattern.permute.xlu1 %v1841_v4  ;;  %v2346_v49 = vpop.permute.xlu1 %860  ;;  %v856_v35 = vadd.f32 %v852_v42, %v828_v53 }
 0x184   : > { %v857_v59 = vadd.f32 %v853_v38, %v829_v17 }
 0x185   : > { %v2352_v63 = vpop.permute.xlu0 %892 }
 0x187   : > { %v2350_v22 = vpop.permute.xlu1 %864 }
 0x188   : > { %v870_v36 = vsel %vm588_vm4, %v2350_v22, %v2346_v49 }
 0x189   : > { %v2356_v60 = vpop.permute.xlu0 %901 }
 0x18e   : > { %v2362_v4 = vpop.permute.xlu0 %929 }
 0x193   : > { %v2366_v12 = vpop.permute.xlu0 %961 }
 0x194   : > { %v2354_v56 = vpop.permute.xlu1 %873 }
 0x195   : > { %v881_v43 = vmul.f32 %v2354_v56, %v870_v36 }
 0x197   : > { %v885_v19 = vadd.f32 %v881_v43, %v857_v59 }
 0x198   : > { %v2358_v48 = vpop.permute.xlu1 %888  ;;  %v822_v5 = vpop.permute.xlu0 %821 }
 0x199   : > { %v826_v46 = vmul.f32 %v822_v5, %v813_v14  ;;  %v827_v52 = vmul.f32 %v822_v5, %v815_v15  ;;  %v843_v5 = vsel %vm557_vm3, %v839_v45, %v2338_v0  ;;  %v868_v45 = vsel %vm588_vm4, %v2346_v49, %v2350_v22 }
 0x19a   : > { %v855_v0 = vmul.f32 %v2311_v37, %v843_v5  ;;  %v880_v20 = vmul.f32 %v2354_v56, %v868_v45  ;;  %v896_v37 = vsel %vm619_vm5, %v2358_v48, %v2352_v63  ;;  %v898_v13 = vsel %vm619_vm5, %v2352_v63, %v2358_v48 }
 0x19b   : > { %v830_v55 = vadd.f32 %v826_v46, %v802_v34  ;;  %v831_v29 = vadd.f32 %v827_v52, %v803_v44  ;;  %v883_v63 = vmul.f32 %v2348_v58, %v871_v57  ;;  %v908_v16 = vmul.f32 %v2356_v60, %v896_v37 }
 0x19c   : > { %v2360_v30 = vpop.permute.xlu1 %890  ;;  %v923_v26 = vpop.permute.xlu0 %922  ;;  %v909_v18 = vmul.f32 %v2356_v60, %v898_v13 }
 0x19d   : > { %v858_v61 = vadd.f32 %v854_v21, %v830_v55  ;;  %v859_v2 = vadd.f32 %v855_v0, %v831_v29 }
 0x19e   : > { %v913_v38 = vadd.f32 %v909_v18, %v885_v19 }
 0x19f   : > { %v887_v46 = vadd.f32 %v883_v63, %v859_v2  ;;  %v1858_v63 = vmov 1966171168  }
 0x1a0   : > { %v2364_v39 = vpop.permute.xlu1 %894  ;;  %v947_v33 = vpop.permute.xlu0 %946 }
 0x1a1   : > { %v897_v49 = vsel %vm619_vm5, %v2360_v30, %v2364_v39  ;;  %v899_v22 = vsel %vm619_vm5, %v2364_v39, %v2360_v30 }
 0x1a4   : > { %v2368_v62 = vpop.permute.xlu1 %905  ;;  %v951_v48 = vpop.permute.xlu0 %950 }
 0x1a5   : > { %v910_v14 = vmul.f32 %v2368_v62, %v897_v49  ;;  %v911_v15 = vmul.f32 %v2368_v62, %v899_v22  ;;  %v884_v62 = vadd.f32 %v880_v20, %v856_v35  ;;  %v953_v60 = vsel %vm681_vm7, %v947_v33, %v951_v48 }
 0x1a6   : > { %v955_v41 = vsel %vm681_vm7, %v951_v48, %v947_v33  ;;  %v966_v55 = vmul.f32 %v2366_v12, %v953_v60  ;;  %v1017_v48 = vunpack.c.l.s4 %v1858_v63 }
 0x1a7   : > { %v915_v34 = vadd.f32 %v911_v15, %v887_v46  ;;  %v912_v42 = vadd.f32 %v908_v16, %v884_v62  ;;  %v967_v29 = vmul.f32 %v2366_v12, %v955_v41 }
 0x1a8   : > { %v2374_v1 = vpop.permute.xlu1 %916  ;;  %v1018_v46 = vunpack.c.0.s8 %v1017_v48 }
 0x1aa   : > { %v2513_v60 = vsub.s32 %v1018_v46, %v1955_v6 }
 0x1ac   : > { %v2396_v25 = vpop.permute.xlu1 %933 }
 0x1b1   : > { %v2418_v28 = vpop.permute.xlu1 %957 }
 0x1b5   : > { %v919_v23 = vpop.permute.xlu1 %918 }
 0x1b6   : > { %v925_v56 = vsel %vm650_vm6, %v919_v23, %v923_v26  ;;  %v927_v11 = vsel %vm650_vm6, %v923_v26, %v919_v23  ;;  %v886_v26 = vadd.f32 %v882_v31, %v858_v61 }
 0x1b7   : > { %v938_v58 = vmul.f32 %v2396_v25, %v925_v56  ;;  %v939_v52 = vmul.f32 %v2396_v25, %v927_v11 }
 0x1b8   : > { %v914_v32 = vadd.f32 %v910_v14, %v886_v26 }
 0x1b9   : > { %v921_v51 = vpop.permute.xlu1 %920  ;;  %v943_v5 = vadd.f32 %v939_v52, %v915_v34 }
 0x1ba   : > { %v924_v30 = vsel %vm650_vm6, %v2374_v1, %v921_v51  ;;  %v926_v39 = vsel %vm650_vm6, %v921_v51, %v2374_v1  ;;  %v942_v24 = vadd.f32 %v938_v58, %v914_v32 }
 0x1bb   : > { %v936_v44 = vmul.f32 %v2362_v4, %v924_v30  ;;  %v937_v1 = vmul.f32 %v2362_v4, %v926_v39  ;;  %v971_v21 = vadd.f32 %v967_v29, %v943_v5  ;;  %v2961_v29 = vmov 4  }
 0x1bc   : > { %v970_v57 = vadd.f32 %v966_v55, %v942_v24 }
 0x1bd   : > { %v945_v9 = vpop.permute.xlu1 %944  ;;  %v940_v53 = vadd.f32 %v936_v44, %v912_v42  ;;  %v941_v17 = vadd.f32 %v937_v1, %v913_v38 }
 0x1c1   : > { %v949_v25 = vpop.permute.xlu1 %948 }
 0x1c2   : > { %v952_v23 = vsel %vm681_vm7, %v945_v9, %v949_v25  ;;  %v954_v33 = vsel %vm681_vm7, %v949_v25, %v945_v9 }
 0x1c3   : > { %v964_v40 = vmul.f32 %v2418_v28, %v952_v23  ;;  %v965_v4 = vmul.f32 %v2418_v28, %v954_v33  ;;  %v425_v28 = vld [vmem:[%s2941_s9] sm:$0x3]  ;;  %v2963_v23 = vmov 6   ;;  %v2964_v33 = vmov 7  }
 0x1c4   : > { %v1004_v18 = vrot.slane %v425_v28, %v1960_v7  ;;  %v1008_v30 = vrot.slane %v425_v28, %v1963_v8 }
 0x1c5   : > { %v968_v0 = vadd.f32 %v964_v40, %v940_v53  ;;  %v969_v45 = vadd.f32 %v965_v4, %v941_v17  ;;  %v990_v36 = vpop.permute.xlu1 %989  ;;  %v2965_v53 = vmov 8   ;;  %v2966_v17 = vmov 0  }
 0x1c6   : > { %v995_v31 = vrot.slane %v990_v36, %v1960_v7  ;;  %v2967_v40 = vmov 3  }
 0x1c7   : > { %v972_v35 = vadd.f32 %v970_v57, %v968_v0  ;;  %v979_v59 = vadd.f32 %v971_v21, %v969_v45 }
 0x1c9   : > { %v973_v12 = vrot.slane %v972_v35, 4  ;;  %v980_v20 = vrot.slane %v979_v59, 4  ;;  %v2498_v43 = vpop.permute.xlu1 %1052 }
 0x1cb   : > { %v981_v61 = vadd.f32 %v980_v20, %v979_v59  ;;  %v974_v2 = vadd.f32 %v973_v12, %v972_v35 }
 0x1cd   : > { %v982_v37 = vrot.slane %v981_v61, 2  ;;  %v975_v13 = vrot.slane %v974_v2, 2 }
 0x1ce   : > { %v2500_v51 = vpop.permute.xlu1 %1079 }
 0x1cf   : > { %v983_v49 = vadd.f32 %v982_v37, %v981_v61  ;;  %v976_v22 = vadd.f32 %v975_v13, %v974_v2 }
 0x1d1   : > { %v984_v56 = vrot.slane %v983_v49, 1  ;;  %v977_v11 = vrot.slane %v976_v22, 1 }
 0x1d3   : > { %v985_v14 = vadd.f32 %v984_v56, %v983_v49  ;;  %v978_v15 = vadd.f32 %v977_v11, %v976_v22  ;;  %v2506_v16 = vpop.permute.xlu1 %1114 }
 0x1d5   : > { %v996_v39 = vadd.f32 %v995_v31, %v978_v15  ;;  %v997_v26 = vadd.f32 %v995_v31, %v985_v14 }
 0x1d7   : > { %v998_v58 = vmax.f32 %v996_v39, 0.0  ;;  %v999_v52 = vmax.f32 %v997_v26, 0.0 }
 0x1d8   : > { %v2510_v9 = vpop.permute.xlu1 %1141 }
 0x1d9   : > { %v1011_v62 = vmul.f32 %v1004_v18, %v998_v58  ;;  %v1012_v19 = vmul.f32 %v1008_v30, %v999_v52 }
 0x1db   : > { %1040 = vrot.lane.b32.xlu1 %v1012_v19, %s1859_s27  ;;  %1038 = vrot.lane.b32.xlu0 %v1011_v62, %s1859_s27  ;;  %v1015_v41 = vcombine.low %v1011_v62, %v1012_v19  ;;  %v2549_v38 = vrot.slane %v1011_v62, %v1960_v7  ;;  %v2552_v24 = vrot.slane %v1012_v19, %v1960_v7 }
 0x1dd   : > { %v2517_v32 = vpop.permute.xlu1 %1176  ;;  %v1022_v34 = vrot.slane %v1015_v41, %v2513_v60 }
 0x1df   : > { %1071 = vrot.lane.b32.xlu1 %v1011_v62, %s1860_s13  ;;  %1073 = vrot.lane.b32.xlu0 %v1012_v19, %s1860_s13  ;;  %v1029_v6 = vrot.slane %v1022_v34, %v2513_v60 }
 0x1e1   : > { %1035 = vst.msk [vmem:[%s423_s30] sm:$0x3] %vm2525_vm8, %v1029_v6 }
 0x1e2   : > { %v2534_v1 = vpop.permute.xlu1 %1203 }
 0x1e3   : > { %1102 = vrot.lane.b32.xlu1 %v1011_v62, %s1861_s14  ;;  %1135 = vrot.lane.b32.xlu0 %v1012_v19, %s1862_s15 }
 0x1e7   : > { %1104 = vrot.lane.b32.xlu1 %v1012_v19, %s1861_s14  ;;  %1228 = vrot.lane.b32.xlu0 %v1012_v19, %s1863_s16  ;;  %v2540_v3 = vpop.permute.xlu1 %1238 }
 0x1eb   : > { %1133 = vrot.lane.b32.xlu1 %v1011_v62, %s1862_s15  ;;  %1392 = vperm.xlu0 %1812, %v2306_v27  }
 0x1ec   : > { %v2544_v42 = vpop.permute.xlu1 %1265 }
 0x1ef   : > { %1164 = vrot.lane.b32.xlu1 %v1011_v62, %s1864_s17  ;;  %1813 = vset.pattern.permute.xlu0 %v1843_v10 }
 0x1f0   : > { %1110 = vperm.xlu0 %1813, %v2265_v54   ;;  %v2962_v54 = vmov 5  }
 0x1f1   : > { %v1294_v5 = vpop.permute.xlu1 %1293 }
 0x1f2   : > { %v2556_v25 = vmul.f32 %v2549_v38, %v1294_v5  ;;  %v2559_v55 = vmul.f32 %v2552_v24, %v1294_v5 }
 0x1f3   : > { %1166 = vrot.lane.b32.xlu1 %v1012_v19, %s1864_s17 }
 0x1f4   : > { %1424 = vperm.xlu0 %1813, %v2336_v50  }
 0x1f6   : > { %v2608_v35 = vpop.permute.xlu1 %1316 }
 0x1f7   : > { %1195 = vrot.lane.b32.xlu1 %v1011_v62, %s1865_s18 }
 0x1f8   : > { %1817 = vset.pattern.permute.xlu0 %v2961_v29 }
 0x1f9   : > { %1476 = vperm.xlu0 %1817, %v2306_v27  }
 0x1fa   : > { %v2612_v12 = vpop.permute.xlu1 %1368 }
 0x1fb   : > { %1197 = vrot.lane.b32.xlu1 %v1012_v19, %s1865_s18 }
 0x1fd   : > { %1820 = vset.pattern.permute.xlu0 %v2962_v54 }
 0x1fe   : > { %1508 = vperm.xlu0 %1820, %v2336_v50  }
 0x1ff   : > { %1226 = vrot.lane.b32.xlu1 %v1011_v62, %s1863_s16 }
 0x202   : > { %1821 = vset.pattern.permute.xlu0 %v2963_v23 }
 0x203   : > { %1396 = vperm.xlu1 %1814, %v2336_v50   ;;  %1532 = vperm.xlu0 %1821, %v2306_v27  }
 0x207   : > { %1257 = vrot.lane.b32.xlu1 %v1011_v62, %s1866_s19  ;;  %1824 = vset.pattern.permute.xlu0 %v2964_v33 }
 0x208   : > { %1815 = vset.pattern.permute.xlu1 %v1843_v10  ;;  %1564 = vperm.xlu0 %1824, %v2336_v50   ;;  %v2586_v10 = vpop.permute.xlu0 %1145 }
 0x20b   : > { %1259 = vrot.lane.b32.xlu1 %v1012_v19, %s1866_s19 }
 0x20c   : > { %1825 = vset.pattern.permute.xlu0 %v2965_v53  ;;  %v2589_v4 = vpop.permute.xlu0 %1172 }
 0x20d   : > { %1576 = vperm.xlu0 %1825, %v2306_v27  }
 0x20f   : > { %1420 = vperm.xlu1 %1815, %v2306_v27  }
 0x210   : > { %v2594_v57 = vpop.permute.xlu0 %1207 }
 0x211   : > { %1828 = vset.pattern.permute.xlu0 %v2966_v17 }
 0x213   : > { %1816 = vset.pattern.permute.xlu1 %v2967_v40 }
 0x214   : > { %1448 = vperm.xlu1 %1816, %v2306_v27   ;;  %v2599_v21 = vpop.permute.xlu0 %1234 }
 0x218   : > { %1452 = vperm.xlu1 %1816, %v2336_v50   ;;  %v2603_v0 = vpop.permute.xlu0 %1269 }
 0x21c   : > { %1818 = vset.pattern.permute.xlu1 %v2961_v29  ;;  %v2606_v45 = vpop.permute.xlu0 %1289 }
 0x21d   : > { %1480 = vperm.xlu1 %1818, %v2336_v50  }
 0x220   : > { %v1048_v36 = vpop.permute.xlu0 %1047 }
 0x221   : > { %1819 = vset.pattern.permute.xlu1 %v2962_v54 }
 0x222   : > { %1504 = vperm.xlu1 %1819, %v2306_v27  }
 0x224   : > { %v2610_v59 = vpop.permute.xlu0 %1321 }
 0x226   : > { %1822 = vset.pattern.permute.xlu1 %v2963_v23 }
 0x227   : > { %1536 = vperm.xlu1 %1822, %v2336_v50  }
 0x22b   : > { %1823 = vset.pattern.permute.xlu1 %v2964_v33 }
 0x22c   : > { %1560 = vperm.xlu1 %1823, %v2306_v27   ;;  %v2614_v27 = vpop.permute.xlu0 %1363 }
 0x230   : > { %1826 = vset.pattern.permute.xlu1 %v2965_v53  ;;  %v1084_v61 = vpop.permute.xlu0 %1083 }
 0x231   : > { %1580 = vperm.xlu1 %1826, %v2336_v50  }
 0x235   : > { %1827 = vset.pattern.permute.xlu1 %v2966_v17 }
 0x24d   : > { %v1041_v20 = vpop.permute.xlu1 %1040  ;;  %v1039_v37 = vpop.permute.xlu0 %1038 }
 0x24e   : > { %v1043_v15 = vsel %vm1042_vm10, %v1039_v37, %v1041_v20  ;;  %v1044_v18 = vsel %vm1042_vm10, %v1041_v20, %v1039_v37 }
 0x24f   : > { %v1058_v52 = vrot.slane %v1044_v18, %v1960_v7  ;;  %v1062_v62 = vrot.slane %v1043_v15, %v1960_v7 }
 0x251   : > { %v1072_v2 = vpop.permute.xlu1 %1071  ;;  %v1074_v49 = vpop.permute.xlu0 %1073  ;;  %v1063_v23 = vmul.f32 %v1058_v52, %v1048_v36  ;;  %v1064_v33 = vmul.f32 %v1062_v62, %v1048_v36 }
 0x252   : > { %v1076_v63 = vsel %vm1075_vm9, %v1072_v2, %v1074_v49  ;;  %v1077_v48 = vsel %vm1075_vm9, %v1074_v49, %v1072_v2 }
 0x253   : > { %v1089_v30 = vrot.slane %v1077_v48, %v1960_v7  ;;  %v1093_v39 = vrot.slane %v1076_v63, %v1960_v7 }
 0x255   : > { %v1103_v50 = vpop.permute.xlu1 %1102  ;;  %v1136_v28 = vpop.permute.xlu0 %1135  ;;  %v1094_v41 = vmul.f32 %v1089_v30, %v2500_v51  ;;  %v1095_v34 = vmul.f32 %v1093_v39, %v2500_v51  ;;  %v1096_v36 = vmul.f32 %v1089_v30, %v1084_v61  ;;  %v1066_v30 = vmul.f32 %v1062_v62, %v2498_v43 }
 0x257   : > { %v1098_v2 = vadd.f32 %v1094_v41, %v1063_v23  ;;  %v1099_v37 = vadd.f32 %v1095_v34, %v1064_v33 }
 0x259   : > { %v1105_v13 = vpop.permute.xlu1 %1104  ;;  %v2616_v11 = vpop.permute.xlu0 %1228 }
 0x25a   : > { %v1107_v46 = vsel %vm1106_vm11, %v1103_v50, %v1105_v13  ;;  %v1108_v58 = vsel %vm1106_vm11, %v1105_v13, %v1103_v50 }
 0x25b   : > { %v1120_v6 = vrot.slane %v1108_v58, %v1960_v7  ;;  %v1124_v5 = vrot.slane %v1107_v46, %v1960_v7  ;;  %v1065_v58 = vmul.f32 %v1058_v52, %v2498_v43 }
 0x25d   : > { %v1134_v22 = vpop.permute.xlu1 %1133 }
 0x25e   : > { %v1138_v29 = vsel %vm1137_vm12, %v1134_v22, %v1136_v28  ;;  %v1139_v54 = vsel %vm1137_vm12, %v1136_v28, %v1134_v22  ;;  %v1097_v28 = vmul.f32 %v1093_v39, %v1084_v61  ;;  %v1127_v61 = vmul.f32 %v1120_v6, %v2506_v16 }
 0x25f   : > { %v1151_v51 = vrot.slane %v1139_v54, %v1960_v7  ;;  %v1155_v20 = vrot.slane %v1138_v29, %v1960_v7  ;;  %v1128_v39 = vmul.f32 %v1124_v5, %v2506_v16 }
 0x260   : > { %v1101_v29 = vadd.f32 %v1097_v28, %v1066_v30 }
 0x261   : > { %v1165_v56 = vpop.permute.xlu1 %1164  ;;  %v1156_v15 = vmul.f32 %v1151_v51, %v2510_v9  ;;  %v1157_v18 = vmul.f32 %v1155_v20, %v2510_v9  ;;  %v1100_v9 = vadd.f32 %v1096_v36, %v1065_v58  ;;  %v1158_v54 = vmul.f32 %v1151_v51, %v2586_v10 }
 0x262   : > { %v1159_v23 = vmul.f32 %v1155_v20, %v2586_v10  ;;  %v1132_v33 = vadd.f32 %v1128_v39, %v1101_v29  ;;  %v1305_v29 = vmul.f32 %v2552_v24, %v2606_v45 }
 0x265   : > { %v1167_v31 = vpop.permute.xlu1 %1166 }
 0x266   : > { %v2624_v14 = vpop.permute.xlu0 %1392  ;;  %v1169_v50 = vsel %vm1168_vm13, %v1165_v56, %v1167_v31  ;;  %v1170_v13 = vsel %vm1168_vm13, %v1167_v31, %v1165_v56 }
 0x267   : > { %v1182_v46 = vrot.slane %v1170_v13, %v1960_v7  ;;  %v1186_v56 = vrot.slane %v1169_v50, %v1960_v7 }
 0x269   : > { %v1196_v26 = vpop.permute.xlu1 %1195  ;;  %v1187_v52 = vmul.f32 %v1182_v46, %v2589_v4  ;;  %v1188_v43 = vmul.f32 %v1186_v56, %v2589_v4  ;;  %v1190_v10 = vmul.f32 %v1186_v56, %v2517_v32 }
 0x26b   : > { %v1111_v19 = vpop.permute.xlu0 %1110 }
 0x26c   : > { %v1125_v53 = vmul.f32 %v1120_v6, %v1111_v19  ;;  %v1126_v17 = vmul.f32 %v1124_v5, %v1111_v19  ;;  %v1131_v5 = vadd.f32 %v1127_v61, %v1100_v9  ;;  %v1304_v9 = vmul.f32 %v2549_v38, %v2606_v45 }
 0x26d   : > { %v1198_v40 = vpop.permute.xlu1 %1197 }
 0x26e   : > { %v1129_v49 = vadd.f32 %v1125_v53, %v1098_v2  ;;  %v1130_v22 = vadd.f32 %v1126_v17, %v1099_v37  ;;  %v1200_v63 = vsel %vm1199_vm14, %v1196_v26, %v1198_v40  ;;  %v1201_v48 = vsel %vm1199_vm14, %v1198_v40, %v1196_v26 }
 0x26f   : > { %v1213_v26 = vrot.slane %v1201_v48, %v1960_v7  ;;  %v1217_v34 = vrot.slane %v1200_v63, %v1960_v7  ;;  %v1189_v53 = vmul.f32 %v1182_v46, %v2517_v32  ;;  %v1162_v37 = vadd.f32 %v1158_v54, %v1131_v5  ;;  %v426_v54 = vld [vmem:[%s2942_s10] sm:$0x3] }
 0x270   : > { %v1160_v19 = vadd.f32 %v1156_v15, %v1129_v49  ;;  %v1161_v41 = vadd.f32 %v1157_v18, %v1130_v22  ;;  %v1340_v38 = vrot.slane %v426_v54, %v1963_v8 }
 0x271   : > { %v1227_v31 = vpop.permute.xlu1 %1226  ;;  %v1218_v4 = vmul.f32 %v1213_v26, %v2534_v1  ;;  %v1219_v51 = vmul.f32 %v1217_v34, %v2534_v1  ;;  %v1220_v13 = vmul.f32 %v1213_v26, %v2594_v57  ;;  %v1221_v49 = vmul.f32 %v1217_v34, %v2594_v57 }
 0x272   : > { %v1231_v16 = vsel %vm1230_vm15, %v1227_v31, %v2616_v11  ;;  %v1232_v62 = vsel %vm1230_vm15, %v2616_v11, %v1227_v31  ;;  %v1191_v17 = vadd.f32 %v1187_v52, %v1160_v19  ;;  %v1192_v40 = vadd.f32 %v1188_v43, %v1161_v41 }
 0x273   : > { %v1244_v20 = vrot.slane %v1232_v62, %v1960_v7  ;;  %v1248_v2 = vrot.slane %v1231_v16, %v1960_v7  ;;  %v1163_v11 = vadd.f32 %v1159_v23, %v1132_v33  ;;  %v1193_v32 = vadd.f32 %v1189_v53, %v1162_v37 }
 0x274   : > { %v1222_v36 = vadd.f32 %v1218_v4, %v1191_v17  ;;  %v1223_v28 = vadd.f32 %v1219_v51, %v1192_v40  ;;  %v1336_v33 = vrot.slane %v426_v54, %v1960_v7 }
 0x275   : > { %v1194_v22 = vadd.f32 %v1190_v10, %v1163_v11  ;;  %v1249_v63 = vmul.f32 %v1244_v20, %v2599_v21  ;;  %v1250_v1 = vmul.f32 %v1248_v2, %v2599_v21  ;;  %v1251_v48 = vmul.f32 %v1244_v20, %v2540_v3  ;;  %v1605_v20 = vld [vmem:[#allocation3] sm:$0x1]  ;;  %v1425_v11 = vpop.permute.xlu0 %1424 }
 0x276   : > { %v1252_v15 = vmul.f32 %v1248_v2, %v2540_v3  ;;  %v1224_v46 = vadd.f32 %v1220_v13, %v1193_v32 }
 0x277   : > { %v1225_v56 = vadd.f32 %v1221_v49, %v1194_v22  ;;  %v1253_v61 = vadd.f32 %v1249_v63, %v1222_v36  ;;  %v1254_v39 = vadd.f32 %v1250_v1, %v1223_v28 }
 0x278   : > { %v1255_v21 = vadd.f32 %v1251_v48, %v1224_v46 }
 0x279   : > { %v1256_v19 = vadd.f32 %v1252_v15, %v1225_v56 }
 0x27e   : > { %v2681_v6 = vpop.permute.xlu1 %1396 }
 0x282   : > { %v1258_v50 = vpop.permute.xlu1 %1257 }
 0x286   : > { %v1260_v18 = vpop.permute.xlu1 %1259 }
 0x287   : > { %v1262_v57 = vsel %vm1261_vm0, %v1258_v50, %v1260_v18  ;;  %v1263_v31 = vsel %vm1261_vm0, %v1260_v18, %v1258_v50  ;;  %v2799_v50 = vpop.permute.xlu0 %1476 }
 0x288   : > { %v1275_v58 = vrot.slane %v1263_v31, %v1960_v7  ;;  %v1279_v30 = vrot.slane %v1262_v57, %v1960_v7 }
 0x28a   : > { %v1280_v41 = vmul.f32 %v1275_v58, %v2544_v42  ;;  %v1281_v3 = vmul.f32 %v1279_v30, %v2544_v42  ;;  %v1282_v26 = vmul.f32 %v1275_v58, %v2603_v0  ;;  %v1283_v34 = vmul.f32 %v1279_v30, %v2603_v0 }
 0x28b   : > { %v2803_v49 = vpop.permute.xlu0 %1508 }
 0x28c   : > { %v1284_v23 = vadd.f32 %v1280_v41, %v1253_v61  ;;  %v1285_v52 = vadd.f32 %v1281_v3, %v1254_v39  ;;  %v1286_v43 = vadd.f32 %v1282_v26, %v1255_v21  ;;  %v1287_v16 = vadd.f32 %v1283_v34, %v1256_v19 }
 0x28e   : > { %v1308_v62 = vadd.f32 %v1304_v9, %v1284_v23  ;;  %v1309_v42 = vadd.f32 %v1305_v29, %v1285_v52  ;;  %v1310_v5 = vadd.f32 %v2556_v25, %v1286_v43  ;;  %v1311_v0 = vadd.f32 %v2559_v55, %v1287_v16 }
 0x28f   : > { %v2807_v22 = vpop.permute.xlu0 %1532 }
 0x290   : > { %v1324_v24 = vadd.f32 %v2608_v35, %v1308_v62  ;;  %v1325_v45 = vadd.f32 %v2608_v35, %v1309_v42  ;;  %v1326_v53 = vadd.f32 %v2610_v59, %v1310_v5  ;;  %v1327_v40 = vadd.f32 %v2610_v59, %v1311_v0  ;;  %v2789_v59 = vpop.permute.xlu1 %1420 }
 0x292   : > { %v1328_v10 = vmax.f32 %v1324_v24, 0.0  ;;  %v1329_v17 = vmax.f32 %v1325_v45, 0.0  ;;  %v1330_v4 = vmax.f32 %v1326_v53, 0.0  ;;  %v1331_v8 = vmax.f32 %v1327_v40, 0.0 }
 0x293   : > { %v2811_v28 = vpop.permute.xlu0 %1564 }
 0x294   : > { %v2721_v51 = vmul.f32 %v1336_v33, %v1328_v10  ;;  %v2723_v25 = vmul.f32 %v1340_v38, %v1329_v17  ;;  %v2729_v55 = vmul.f32 %v1336_v33, %v1330_v4  ;;  %v2735_v35 = vmul.f32 %v1340_v38, %v1331_v8  ;;  %v2795_v2 = vpop.permute.xlu1 %1448 }
 0x296   : > { %1353 = vrot.lane.b32.xlu0 %v2723_v25, %s1859_s27  ;;  %1349 = vrot.lane.b32.xlu1 %v2721_v51, %s1859_s27 }
 0x297   : > { %v2815_v1 = vpop.permute.xlu0 %1576 }
 0x298   : > { %v2797_v37 = vpop.permute.xlu1 %1452 }
 0x29a   : > { %1379 = vrot.lane.b32.xlu0 %v2721_v51, %s1860_s13  ;;  %1351 = vrot.lane.b32.xlu1 %v2729_v55, %s1859_s27 }
 0x29c   : > { %v2801_v13 = vpop.permute.xlu1 %1480 }
 0x29e   : > { %1383 = vrot.lane.b32.xlu0 %v2723_v25, %s1860_s13  ;;  %1355 = vrot.lane.b32.xlu1 %v2735_v35, %s1859_s27 }
 0x2a0   : > { %v2805_v32 = vpop.permute.xlu1 %1504 }
 0x2a2   : > { %1407 = vrot.lane.b32.xlu0 %v2721_v51, %s1861_s14  ;;  %1381 = vrot.lane.b32.xlu1 %v2729_v55, %s1860_s13 }
 0x2a4   : > { %v2809_v36 = vpop.permute.xlu1 %1536 }
 0x2a6   : > { %1411 = vrot.lane.b32.xlu0 %v2723_v25, %s1861_s14  ;;  %1385 = vrot.lane.b32.xlu1 %v2735_v35, %s1860_s13 }
 0x2a8   : > { %v2813_v63 = vpop.permute.xlu1 %1560 }
 0x2aa   : > { %1437 = vrot.lane.b32.xlu0 %v2729_v55, %s1862_s15  ;;  %1409 = vrot.lane.b32.xlu1 %v2729_v55, %s1861_s14 }
 0x2ac   : > { %v2817_v48 = vpop.permute.xlu1 %1580 }
 0x2ae   : > { %1441 = vrot.lane.b32.xlu0 %v2735_v35, %s1862_s15  ;;  %1413 = vrot.lane.b32.xlu1 %v2735_v35, %s1861_s14 }
 0x2b2   : > { %1467 = vrot.lane.b32.xlu0 %v2723_v25, %s1864_s17  ;;  %1435 = vrot.lane.b32.xlu1 %v2721_v51, %s1862_s15 }
 0x2b6   : > { %1493 = vrot.lane.b32.xlu0 %v2729_v55, %s1865_s18  ;;  %1439 = vrot.lane.b32.xlu1 %v2723_v25, %s1862_s15 }
 0x2ba   : > { %1497 = vrot.lane.b32.xlu0 %v2735_v35, %s1865_s18  ;;  %1463 = vrot.lane.b32.xlu1 %v2721_v51, %s1864_s17 }
 0x2be   : > { %1523 = vrot.lane.b32.xlu0 %v2723_v25, %s1863_s16  ;;  %1465 = vrot.lane.b32.xlu1 %v2729_v55, %s1864_s17 }
 0x2c2   : > { %1549 = vrot.lane.b32.xlu0 %v2729_v55, %s1866_s19  ;;  %1469 = vrot.lane.b32.xlu1 %v2735_v35, %s1864_s17 }
 0x2c6   : > { %1553 = vrot.lane.b32.xlu0 %v2735_v35, %s1866_s19  ;;  %1491 = vrot.lane.b32.xlu1 %v2721_v51, %s1865_s18 }
 0x2ca   : > { %1495 = vrot.lane.b32.xlu1 %v2723_v25, %s1865_s18 }
 0x2ce   : > { %1519 = vrot.lane.b32.xlu1 %v2721_v51, %s1863_s16 }
 0x2d2   : > { %1521 = vrot.lane.b32.xlu1 %v2729_v55, %s1863_s16 }
 0x2d6   : > { %1525 = vrot.lane.b32.xlu1 %v2735_v35, %s1863_s16 }
 0x2da   : > { %1547 = vrot.lane.b32.xlu1 %v2721_v51, %s1866_s19 }
 0x2de   : > { %1551 = vrot.lane.b32.xlu1 %v2723_v25, %s1866_s19 }
 0x2e2   : > { %1608 = vperm.xlu1 %1827, %v1605_v20  }
 0x308   : > { %v1354_v15 = vpop.permute.xlu0 %1353  ;;  %v1350_v18 = vpop.permute.xlu1 %1349 }
 0x309   : > { %v1357_v17 = vsel %vm1042_vm10, %v1350_v18, %v1354_v15  ;;  %v1359_v40 = vsel %vm1042_vm10, %v1354_v15, %v1350_v18 }
 0x30a   : > { %v1371_v15 = vmul.f32 %v2614_v27, %v1359_v40  ;;  %v1372_v18 = vmul.f32 %v2614_v27, %v1357_v17 }
 0x30c   : > { %v1380_v46 = vpop.permute.xlu0 %1379  ;;  %v1352_v56 = vpop.permute.xlu1 %1351 }
 0x310   : > { %v1384_v57 = vpop.permute.xlu0 %1383  ;;  %v1356_v31 = vpop.permute.xlu1 %1355 }
 0x311   : > { %v1387_v5 = vsel %vm1075_vm9, %v1380_v46, %v1384_v57  ;;  %v1389_v0 = vsel %vm1075_vm9, %v1384_v57, %v1380_v46  ;;  %v1358_v33 = vsel %vm1042_vm10, %v1352_v56, %v1356_v31  ;;  %v1360_v38 = vsel %vm1042_vm10, %v1356_v31, %v1352_v56 }
 0x312   : > { %v1399_v8 = vmul.f32 %v2624_v14, %v1389_v0  ;;  %v1400_v20 = vmul.f32 %v2624_v14, %v1387_v5  ;;  %v1373_v46 = vmul.f32 %v2612_v12, %v1360_v38 }
 0x314   : > { %v1408_v58 = vpop.permute.xlu0 %1407  ;;  %v1382_v30 = vpop.permute.xlu1 %1381  ;;  %v1403_v0 = vadd.f32 %v1399_v8, %v1371_v15 }
 0x318   : > { %v1386_v61 = vpop.permute.xlu1 %1385  ;;  %v1412_v39 = vpop.permute.xlu0 %1411 }
 0x319   : > { %v1388_v43 = vsel %vm1075_vm9, %v1382_v30, %v1386_v61  ;;  %v1390_v16 = vsel %vm1075_vm9, %v1386_v61, %v1382_v30  ;;  %v1415_v56 = vsel %vm1106_vm11, %v1408_v58, %v1412_v39  ;;  %v1417_v57 = vsel %vm1106_vm11, %v1412_v39, %v1408_v58 }
 0x31a   : > { %v1401_v24 = vmul.f32 %v2681_v6, %v1390_v16  ;;  %v1402_v45 = vmul.f32 %v2681_v6, %v1388_v43  ;;  %v1374_v6 = vmul.f32 %v2612_v12, %v1358_v33  ;;  %v1427_v39 = vmul.f32 %v2789_v59, %v1417_v57 }
 0x31b   : > { %v1428_v16 = vmul.f32 %v2789_v59, %v1415_v56  ;;  %v1404_v33 = vadd.f32 %v1400_v20, %v1372_v18 }
 0x31c   : > { %v1410_v21 = vpop.permute.xlu1 %1409  ;;  %v1438_v19 = vpop.permute.xlu0 %1437  ;;  %v1431_v17 = vadd.f32 %v1427_v39, %v1403_v0 }
 0x31d   : > { %v1432_v40 = vadd.f32 %v1428_v16, %v1404_v33 }
 0x320   : > { %v1414_v41 = vpop.permute.xlu1 %1413  ;;  %v1442_v26 = vpop.permute.xlu0 %1441 }
 0x321   : > { %v1416_v53 = vsel %vm1106_vm11, %v1410_v21, %v1414_v41  ;;  %v1418_v10 = vsel %vm1106_vm11, %v1414_v41, %v1410_v21  ;;  %v1405_v21 = vadd.f32 %v1401_v24, %v1373_v46  ;;  %v1406_v41 = vadd.f32 %v1402_v45, %v1374_v6 }
 0x322   : > { %v1429_v31 = vmul.f32 %v1425_v11, %v1418_v10  ;;  %v1430_v30 = vmul.f32 %v1425_v11, %v1416_v53  ;;  %v1444_v14 = vsel %vm1137_vm12, %v1438_v19, %v1442_v26  ;;  %v1446_v12 = vsel %vm1137_vm12, %v1442_v26, %v1438_v19 }
 0x323   : > { %v1457_v38 = vmul.f32 %v2797_v37, %v1446_v12  ;;  %v1458_v24 = vmul.f32 %v2797_v37, %v1444_v14 }
 0x324   : > { %v1436_v3 = vpop.permute.xlu1 %1435  ;;  %v1468_v9 = vpop.permute.xlu0 %1467  ;;  %v1433_v19 = vadd.f32 %v1429_v31, %v1405_v21  ;;  %v1434_v26 = vadd.f32 %v1430_v30, %v1406_v41 }
 0x326   : > { %v1461_v8 = vadd.f32 %v1457_v38, %v1433_v19  ;;  %v1462_v20 = vadd.f32 %v1458_v24, %v1434_v26 }
 0x328   : > { %v1440_v34 = vpop.permute.xlu1 %1439  ;;  %v1494_v23 = vpop.permute.xlu0 %1493 }
 0x329   : > { %v1443_v43 = vsel %vm1137_vm12, %v1436_v3, %v1440_v34  ;;  %v1445_v58 = vsel %vm1137_vm12, %v1440_v34, %v1436_v3 }
 0x32a   : > { %v1455_v3 = vmul.f32 %v2795_v2, %v1445_v58  ;;  %v1456_v34 = vmul.f32 %v2795_v2, %v1443_v43 }
 0x32c   : > { %v1464_v29 = vpop.permute.xlu1 %1463  ;;  %v1498_v62 = vpop.permute.xlu0 %1497  ;;  %v1459_v46 = vadd.f32 %v1455_v3, %v1431_v17  ;;  %v1460_v6 = vadd.f32 %v1456_v34, %v1432_v40  ;;  %v1586_v17 = vmul.f32 %v2817_v48, %v2735_v35 }
 0x32d   : > { %v1471_v59 = vsel %vm1168_vm13, %v1464_v29, %v1468_v9  ;;  %v1473_v45 = vsel %vm1168_vm13, %v1468_v9, %v1464_v29  ;;  %v1500_v37 = vsel %vm1199_vm14, %v1494_v23, %v1498_v62  ;;  %v1502_v2 = vsel %vm1199_vm14, %v1498_v62, %v1494_v23 }
 0x32e   : > { %v1483_v9 = vmul.f32 %v2799_v50, %v1473_v45  ;;  %v1484_v29 = vmul.f32 %v2799_v50, %v1471_v59  ;;  %v1513_v15 = vmul.f32 %v2803_v49, %v1502_v2  ;;  %v1514_v23 = vmul.f32 %v2803_v49, %v1500_v37 }
 0x330   : > { %v1466_v54 = vpop.permute.xlu1 %1465  ;;  %v1524_v61 = vpop.permute.xlu0 %1523  ;;  %v1487_v12 = vadd.f32 %v1483_v9, %v1459_v46  ;;  %v1488_v43 = vadd.f32 %v1484_v29, %v1460_v6 }
 0x334   : > { %v1470_v52 = vpop.permute.xlu1 %1469  ;;  %v1550_v53 = vpop.permute.xlu0 %1549 }
 0x335   : > { %v1472_v27 = vsel %vm1168_vm13, %v1466_v54, %v1470_v52  ;;  %v1474_v5 = vsel %vm1168_vm13, %v1470_v52, %v1466_v54 }
 0x336   : > { %v1485_v54 = vmul.f32 %v2801_v13, %v1474_v5  ;;  %v1486_v52 = vmul.f32 %v2801_v13, %v1472_v27 }
 0x338   : > { %v1492_v42 = vpop.permute.xlu1 %1491  ;;  %v1489_v56 = vadd.f32 %v1485_v54, %v1461_v8  ;;  %v1490_v57 = vadd.f32 %v1486_v52, %v1462_v20  ;;  %v1554_v50 = vpop.permute.xlu0 %1553  ;;  %v1583_v52 = vmul.f32 %v2815_v1, %v2721_v51 }
 0x339   : > { %v1556_v27 = vsel %vm1261_vm0, %v1550_v53, %v1554_v50  ;;  %v1558_v5 = vsel %vm1261_vm0, %v1554_v50, %v1550_v53 }
 0x33a   : > { %v1517_v58 = vadd.f32 %v1513_v15, %v1489_v56  ;;  %v1518_v39 = vadd.f32 %v1514_v23, %v1490_v57  ;;  %v1570_v26 = vmul.f32 %v2811_v28, %v1556_v27 }
 0x33c   : > { %v1496_v4 = vpop.permute.xlu1 %1495 }
 0x33d   : > { %v1499_v13 = vsel %vm1199_vm14, %v1492_v42, %v1496_v4  ;;  %v1501_v31 = vsel %vm1199_vm14, %v1496_v4, %v1492_v42 }
 0x33e   : > { %v1511_v14 = vmul.f32 %v2805_v32, %v1501_v31  ;;  %v1512_v49 = vmul.f32 %v2805_v32, %v1499_v13  ;;  %v1569_v32 = vmul.f32 %v2811_v28, %v1558_v5  ;;  %v1584_v28 = vmul.f32 %v2815_v1, %v2723_v25 }
 0x340   : > { %v1520_v11 = vpop.permute.xlu1 %1519  ;;  %v1515_v33 = vadd.f32 %v1511_v14, %v1487_v12  ;;  %v1516_v19 = vadd.f32 %v1512_v49, %v1488_v43 }
 0x341   : > { %v1527_v21 = vsel %vm1230_vm15, %v1520_v11, %v1524_v61  ;;  %v1529_v41 = vsel %vm1230_vm15, %v1524_v61, %v1520_v11 }
 0x342   : > { %v1539_v61 = vmul.f32 %v2807_v22, %v1529_v41  ;;  %v1540_v11 = vmul.f32 %v2807_v22, %v1527_v21 }
 0x344   : > { %v1522_v10 = vpop.permute.xlu1 %1521  ;;  %v1543_v24 = vadd.f32 %v1539_v61, %v1515_v33  ;;  %v1544_v3 = vadd.f32 %v1540_v11, %v1516_v19 }
 0x348   : > { %v1526_v30 = vpop.permute.xlu1 %1525 }
 0x349   : > { %v1528_v62 = vsel %vm1230_vm15, %v1522_v10, %v1526_v30  ;;  %v1530_v18 = vsel %vm1230_vm15, %v1526_v30, %v1522_v10  ;;  %v1585_v10 = vmul.f32 %v2817_v48, %v2729_v55 }
 0x34a   : > { %v1541_v42 = vmul.f32 %v2809_v36, %v1530_v18  ;;  %v1542_v4 = vmul.f32 %v2809_v36, %v1528_v62 }
 0x34c   : > { %v1548_v16 = vpop.permute.xlu1 %1547  ;;  %v1545_v36 = vadd.f32 %v1541_v42, %v1517_v58  ;;  %v1546_v0 = vadd.f32 %v1542_v4, %v1518_v39 }
 0x34e   : > { %v1573_v45 = vadd.f32 %v1569_v32, %v1545_v36  ;;  %v1574_v53 = vadd.f32 %v1570_v26, %v1546_v0 }
 0x350   : > { %v1552_v38 = vpop.permute.xlu1 %1551  ;;  %v1589_v37 = vadd.f32 %v1585_v10, %v1573_v45  ;;  %v1590_v2 = vadd.f32 %v1586_v17, %v1574_v53 }
 0x351   : > { %v1555_v34 = vsel %vm1261_vm0, %v1548_v16, %v1552_v38  ;;  %v1557_v59 = vsel %vm1261_vm0, %v1552_v38, %v1548_v16 }
 0x352   : > { %v1567_v22 = vmul.f32 %v2813_v63, %v1557_v59  ;;  %v1568_v54 = vmul.f32 %v2813_v63, %v1555_v34 }
 0x354   : > { %v1571_v47 = vadd.f32 %v1567_v22, %v1543_v24  ;;  %v1572_v40 = vadd.f32 %v1568_v54, %v1544_v3 }
 0x356   : > { %v1587_v8 = vadd.f32 %v1583_v52, %v1571_v47  ;;  %v1588_v20 = vadd.f32 %v1584_v28, %v1572_v40 }
 0x358   : > { %v1591_v46 = vadd.f32 %v1589_v37, %v1587_v8  ;;  %v1598_v63 = vadd.f32 %v1590_v2, %v1588_v20 }
 0x35a   : > { %v1599_v6 = vrot.slane %v1598_v63, 4  ;;  %v1592_v9 = vrot.slane %v1591_v46, 4 }
 0x35c   : > { %v1600_v51 = vadd.f32 %v1599_v6, %v1598_v63  ;;  %v1593_v29 = vadd.f32 %v1592_v9, %v1591_v46 }
 0x35d   : > { %v1609_v1 = vpop.permute.xlu1 %1608 }
 0x35e   : > { %v1601_v56 = vrot.slane %v1600_v51, 2  ;;  %v1594_v25 = vrot.slane %v1593_v29, 2  ;;  %v1614_v48 = vrot.slane %v1609_v1, %v1960_v7 }
 0x360   : > { %v1602_v55 = vadd.f32 %v1601_v56, %v1600_v51  ;;  %v1595_v57 = vadd.f32 %v1594_v25, %v1593_v29 }
 0x362   : > { %v1603_v13 = vrot.slane %v1602_v55, 1  ;;  %v1596_v35 = vrot.slane %v1595_v57, 1 }
 0x364   : > { %v1604_v31 = vadd.f32 %v1603_v13, %v1602_v55  ;;  %v1597_v30 = vadd.f32 %v1596_v35, %v1595_v57 }
 0x366   : > { %v1615_v15 = vadd.f32 %v1614_v48, %v1597_v30  ;;  %v1616_v23 = vadd.f32 %v1614_v48, %v1604_v31 }
 0x368   : > { %1829 = vtanh.f32 %v1615_v15 }
 0x369   : > { %1831 = vtanh.f32 %v1616_v23 }
 0x375   : > { %v1830_v62 = vpop.eup %1829 }
 0x376   : > { %v1832_v18 = vpop.eup %1831 }
 0x377   : > { %v1621_v50 = vcombine.low %v1830_v62, %v1832_v18 }
 0x379   : > { %v1628_v21 = vrot.slane %v1621_v50, %v2513_v60 }
 0x37b   : > { %v1635_v41 = vrot.slane %v1628_v21, %v2513_v60 }
 0x37d   : > { %1637 = vst.msk [vmem:[%s419_s24] sm:$0x3] %vm2525_vm8, %v1635_v41 }
 0x37e PF: > { %s27_s25 = sadd.s32 1, %s1839_s25  }
 0x37f   : > { %p24_p4 = scmp.ge.s32.totalorder %s27_s25, 4  }
 0x381   :  { %26 = sbr.rel (!%p24_p4) target bundleno = 3 (0x3), region = 106 }

</bundles_post_ra>
